<compile_context>
chip_gen: v5e
topology: v5e:2x2
jax: 0.10.0
libtpu: 0.0.40
codegen_flags: <defaults>
</compile_context>

<pallas_src>
import functools

import jax
import jax.numpy as jnp
from jax import lax
from jax.experimental import pallas as pl
from jax.experimental.pallas import tpu as pltpu


def _round_up(x, m):
    return ((x + m - 1) // m) * m


def _pick_tile(n, cands):
    for c in cands:
        if n % c == 0:
            return c
    return n


# ---------------------------------------------------------------------------
# Kernel 1: Linear (z @ W + b), two large output-feature tiles (one per v7x TC).
# ---------------------------------------------------------------------------
def _linear_kernel(z_ref, w_ref, b_ref, o_ref):
    o_ref[...] = (
        jnp.dot(z_ref[...], w_ref[...], preferred_element_type=jnp.float32)
        + b_ref[...]
    ).astype(o_ref.dtype)


def linear_pallas(z, w, b):
    B, K = z.shape
    N = w.shape[1]
    TN = _pick_tile(N, (4096, 2048, 1024, 512, 256, 128))
    return pl.pallas_call(
        _linear_kernel,
        grid=(N // TN,),
        in_specs=[
            pl.BlockSpec((B, K), lambda j: (0, 0)),
            pl.BlockSpec((K, TN), lambda j: (0, j)),
            pl.BlockSpec((1, TN), lambda j: (0, j)),
        ],
        out_specs=pl.BlockSpec((B, TN), lambda j: (0, j)),
        out_shape=jax.ShapeDtypeStruct((B, N), jnp.float32),
        compiler_params=pltpu.CompilerParams(dimension_semantics=("parallel",)),
    )(z.astype(jnp.bfloat16), w.astype(jnp.bfloat16),
      b.reshape(1, N).astype(jnp.float32))


# ---------------------------------------------------------------------------
# Kernel 2: per-channel sum / sum-of-squares (only for the first BatchNorm).
# ---------------------------------------------------------------------------
def _stats_kernel(x_ref, o_ref):
    x = x_ref[...].astype(jnp.float32)
    o_ref[0, 0:1, :] = jnp.sum(x, axis=0, keepdims=True)
    o_ref[0, 1:2, :] = jnp.sum(x * x, axis=0, keepdims=True)


def channel_stats_pallas(x2d):
    R, C = x2d.shape
    TR = _pick_tile(R, (2048, 1024, 512, 256, 128, 64, 32, 16, 8))
    nt = R // TR
    return pl.pallas_call(
        _stats_kernel,
        grid=(nt,),
        in_specs=[pl.BlockSpec((TR, C), lambda i: (i, 0))],
        out_specs=pl.BlockSpec((1, 2, C), lambda i: (i, 0, 0)),
        out_shape=jax.ShapeDtypeStruct((nt, 2, C), jnp.float32),
        compiler_params=pltpu.CompilerParams(dimension_semantics=("parallel",)),
    )(x2d)


# ---------------------------------------------------------------------------
# Kernel 3: fused [previous BN affine (+LeakyReLU)] -> (optional nearest 2x upsample)
#           -> 3x3 conv (+bias) -> per-image per-channel stats of the output.
# Grid = (batch, row-chunk).  The halo scratch is filled once per image (rc==0);
# each row chunk runs 9 accumulated MXU matmuls on a small, register-resident
# accumulator (bias folded into its init) and stores lane-dense interior rows.
# ---------------------------------------------------------------------------
def _conv3x3_kernel(x_ref, a_ref, b_ref, w_ref, bias_ref, y_ref, st_ref, pad_ref, *,
                    H, W, Wp, PW, G, RH, up, negative_slope):
    # x_ref   : (1, Hin, Win, Cin) bf16   pre-upsample input image (DMA'd once per image)
    # a/b_ref : (1, Cin) f32              previous BatchNorm folded to  a*x + b
    # w_ref   : (9, Cin, Cout) bf16       tap-major weights
    # bias_ref: (1, Cout) f32
    # y_ref   : (1, RH, W, Cout)          this row-chunk of the conv output (+bias)
    # st_ref  : (1, 2, Cout) f32          per-image [sum, sumsq] accumulator (revisited over rc)
    # pad_ref : ((H+2)*Wp + 2G, Cin) bf16 flattened zero-padded (upsampled) halo, VMEM scratch
    Hin, Win, Cin = x_ref.shape[1], x_ref.shape[2], x_ref.shape[3]
    Cout = w_ref.shape[-1]
    Ns = pad_ref.shape[0]
    pdt = pad_ref.dtype
    rc = pl.program_id(1)

    # ---- once per image (first row-chunk): normalize + upsample + scatter into the halo.
    @pl.when(rc == 0)
    def _fill():
        st_ref[...] = jnp.zeros_like(st_ref)
        # Zero only the border cells the taps read (not the whole scratch):
        #   guard + top halo row + left pad of image row 0 ...
        pad_ref[0:G + Wp + PW, :] = jnp.zeros((G + Wp + PW, Cin), pdt)
        #   ... and the tail of the bottom halo row + guard; the per-row gap stores below
        #   cover every remaining right-pad/left-pad column pair.
        bot = G + (H + 1) * Wp + PW
        pad_ref[bot:Ns, :] = jnp.zeros((Ns - bot, Cin), pdt)

        gap0 = jnp.zeros((2 * PW, Cin), pdt)
        if up == 2:
            # 0/1 duplication matrix D[i, j] = (j == i // 2): nearest 2x width upsample as a
            # tiny exact MXU matmul (no sublane-interleave value reshape needed).
            oi = lax.broadcasted_iota(jnp.int32, (W, Win), 0)
            ci = lax.broadcasted_iota(jnp.int32, (W, Win), 1)
            dup = (oi // 2 == ci).astype(pdt)
        for rin in range(Hin):
            # Previous layer's BatchNorm (+ optional LeakyReLU), one input row at a time.
            row = x_ref[0, rin].astype(jnp.float32) * a_ref[...] + b_ref[...]
            if negative_slope is not None:
                row = jnp.where(row >= 0.0, row, negative_slope * row)
            rowt = row.astype(pdt)
            if up == 2:
                rowt = jnp.dot(dup, rowt, preferred_element_type=jnp.float32).astype(pdt)
            for k in range(up):
                r = up * rin + k                        # nearest 2x row duplication
                off = G + (r + 1) * Wp + PW             # 8-aligned (G+PW=8, Wp % 8 == 0)
                pad_ref[off:off + W, :] = rowt
                pad_ref[off + W:off + W + 2 * PW, :] = gap0   # right pad of r / left pad of r+1

    # ---- per row-chunk: 9 accumulated MXU matmuls; each tap is one contiguous slice.
    Lc = RH * Wp
    base = rc * Lc
    if Lc % 8 == 0:
        base = pl.multiple_of(base, 8)
    acc = jnp.dot(pad_ref[pl.ds(base + (G - 1), Lc), :], w_ref[0],
                  preferred_element_type=jnp.float32) + bias_ref[...]
    for t in range(1, 9):
        dy, dx = t // 3, t % 3
        acc = acc + jnp.dot(pad_ref[pl.ds(base + (G + dy * Wp + dx - 1), Lc), :],
                            w_ref[t], preferred_element_type=jnp.float32)

    # ---- interior columns only: stats partials (next BatchNorm) + lane-dense output stores.
    ssum = jnp.zeros((1, Cout), jnp.float32)
    ssq = jnp.zeros((1, Cout), jnp.float32)
    for r in range(RH):
        rowo = acc[r * Wp + PW:r * Wp + PW + W, :]
        ssum = ssum + jnp.sum(rowo, axis=0, keepdims=True)
        ssq = ssq + jnp.sum(rowo * rowo, axis=0, keepdims=True)
        y_ref[0, r, :, :] = rowo.astype(y_ref.dtype)
    st_ref[0, 0:1, :] = st_ref[0, 0:1, :] + ssum
    st_ref[0, 1:2, :] = st_ref[0, 1:2, :] + ssq


def conv3x3_fused(x, a, b, w9, bias, *, up=1, negative_slope=None,
                  out_dtype=jnp.bfloat16, max_chunk_rows=256):
    B, Hin, Win, Cin = x.shape
    Cout = w9.shape[-1]
    H, W = up * Hin, up * Win
    PW, G = 4, 4                       # halo width / guard: keeps halo stores 8-aligned
    Wp = W + 2 * PW
    # Largest divisor of H whose flattened chunk stays ~vreg-resident.
    RH = 1
    for d in range(1, H + 1):
        if H % d == 0 and d * Wp <= max_chunk_rows:
            RH = d
    n_chunks = H // RH
    Ns = (H + 2) * Wp + 2 * G

    kern = functools.partial(_conv3x3_kernel, H=H, W=W, Wp=Wp, PW=PW, G=G, RH=RH,
                             up=up, negative_slope=negative_slope)
    # VMEM budget at these shapes is ~1.5 MiB (fits every generation's default scoped VMEM,
    # incl. v7x 32 MiB).  If img_size/ngf scale up, shrink max_chunk_rows / add an H-tile to
    # the x BlockSpec and set pltpu.CompilerParams(vmem_limit_bytes=...) explicitly.
    y, st = pl.pallas_call(
        kern,
        grid=(B, n_chunks),
        in_specs=[
            pl.BlockSpec((1, Hin, Win, Cin), lambda bi, rc: (bi, 0, 0, 0)),
            pl.BlockSpec((1, Cin), lambda bi, rc: (0, 0)),
            pl.BlockSpec((1, Cin), lambda bi, rc: (0, 0)),
            pl.BlockSpec((9, Cin, Cout), lambda bi, rc: (0, 0, 0)),
            pl.BlockSpec((1, Cout), lambda bi, rc: (0, 0)),
        ],
        out_specs=(
            pl.BlockSpec((1, RH, W, Cout), lambda bi, rc: (bi, rc, 0, 0)),
            pl.BlockSpec((1, 2, Cout), lambda bi, rc: (bi, 0, 0)),
        ),
        out_shape=(
            jax.ShapeDtypeStruct((B, H, W, Cout), out_dtype),
            jax.ShapeDtypeStruct((B, 2, Cout), jnp.float32),
        ),
        scratch_shapes=[pltpu.VMEM((Ns, Cin), jnp.bfloat16)],
        compiler_params=pltpu.CompilerParams(
            dimension_semantics=("parallel", "arbitrary")),
    )(x.astype(jnp.bfloat16), a, b, w9, bias)
    return y, st


# ---------------------------------------------------------------------------
# Kernel 4: final BatchNorm2d(affine=False) + tanh; only the nc valid channels
#           are written (compact (R, nc) f32 output, no padded-slab writeback).
# ---------------------------------------------------------------------------
def _bn_act_kernel(x_ref, a_ref, b_ref, o_ref, *, nc, use_tanh):
    y = x_ref[...].astype(jnp.float32) * a_ref[...] + b_ref[...]
    if use_tanh:
        y = jnp.tanh(y)
    o_ref[...] = y[:, :nc].astype(o_ref.dtype)


def bn_act_pallas(x2d, a, b, *, nc, use_tanh):
    R, C = x2d.shape
    TR = _pick_tile(R, (1024, 512, 256, 128, 64, 32, 16, 8))
    return pl.pallas_call(
        functools.partial(_bn_act_kernel, nc=nc, use_tanh=use_tanh),
        grid=(R // TR,),
        in_specs=[
            pl.BlockSpec((TR, C), lambda i: (i, 0)),
            pl.BlockSpec((1, C), lambda i: (0, 0)),
            pl.BlockSpec((1, C), lambda i: (0, 0)),
        ],
        out_specs=pl.BlockSpec((TR, nc), lambda i: (i, 0)),
        out_shape=jax.ShapeDtypeStruct((R, nc), jnp.float32),
        compiler_params=pltpu.CompilerParams(dimension_semantics=("parallel",)),
    )(x2d, a, b)


# ---------------------------------------------------------------------------
# Glue (tiny per-channel math / parameter layout plumbing)
# ---------------------------------------------------------------------------
def _bn_coeffs(partials, count, gamma, beta, eps=1e-5):
    # partials: (n, 2, C) per-tile/per-image [sum, sumsq] -> fold BN into y = a*x + b
    tot = jnp.sum(partials.astype(jnp.float32), axis=0)
    mean = tot[0] / count
    var = jnp.maximum(tot[1] / count - mean * mean, 0.0)   # biased (training) variance
    inv = lax.rsqrt(var + eps)
    if gamma is None:
        a, b = inv, -mean * inv
    else:
        a, b = gamma * inv, beta - mean * gamma * inv
    return (a.reshape(1, -1).astype(jnp.float32),
            b.reshape(1, -1).astype(jnp.float32))


def _pad_to(v, n):
    return jnp.pad(v, ((0, n - v.shape[0]),))


def _prep_conv(w, bias, cin_p, cout_p):
    # w: (3, 3, Cin, Cout) -> (9, cin_p, cout_p) bf16; zero-padded channels stay exact 0.
    _, _, cin, cout = w.shape
    w = jnp.pad(w, ((0, 0), (0, 0), (0, cin_p - cin), (0, cout_p - cout)))
    bias = _pad_to(bias, cout_p)
    return (w.reshape(9, cin_p, cout_p).astype(jnp.bfloat16),
            bias.reshape(1, cout_p).astype(jnp.float32))


# ---------------------------------------------------------------------------
# Parameters (deterministic synthetic init) and forward pass
# ---------------------------------------------------------------------------
def init_params(key, nz, ngf, nc, img_size):
    isz = img_size // 4
    C0 = ngf * 2
    ks = jax.random.split(key, 8)
    s = 0.05
    return {
        "l1_w": jax.random.normal(ks[0], (nz, C0 * isz * isz), jnp.float32) * s,
        "l1_b": jax.random.normal(ks[1], (C0 * isz * isz,), jnp.float32) * s,
        "bn0_g": jnp.ones((C0,), jnp.float32),
        "bn0_b": jnp.zeros((C0,), jnp.float32),
        "conv1_w": jax.random.normal(ks[2], (3, 3, C0, C0), jnp.float32) * s,
        "conv1_b": jax.random.normal(ks[3], (C0,), jnp.float32) * s,
        "bn1_g": jnp.ones((C0,), jnp.float32),
        "bn1_b": jnp.zeros((C0,), jnp.float32),
        "conv2_w": jax.random.normal(ks[4], (3, 3, C0, ngf), jnp.float32) * s,
        "conv2_b": jax.random.normal(ks[5], (ngf,), jnp.float32) * s,
        "bn2_g": jnp.ones((ngf,), jnp.float32),
        "bn2_b": jnp.zeros((ngf,), jnp.float32),
        "conv3_w": jax.random.normal(ks[6], (3, 3, ngf, nc), jnp.float32) * s,
        "conv3_b": jax.random.normal(ks[7], (nc,), jnp.float32) * s,
    }


def generator_a_forward(params, z, *, ngf, nc, img_size, pre_x=False, eps=1e-5):
    B = z.shape[0]
    nz = z.shape[-1]
    isz = img_size // 4
    C0 = ngf * 2
    C1p = _round_up(C0, 128)    # conv1 out channels (lane-padded)
    C2p = _round_up(ngf, 128)   # conv2 out channels (lane-padded)
    C3p = _round_up(nc, 128)    # conv3 out channels (lane-padded)

    # ---- l1: Linear. Weight columns permuted (c,h,w)->(h,w,c) so output is NHWC-ordered.
    wl = params["l1_w"].reshape(nz, C0, isz, isz).transpose(0, 2, 3, 1).reshape(nz, -1)
    bl = params["l1_b"].reshape(C0, isz, isz).transpose(1, 2, 0).reshape(-1)
    x0 = linear_pallas(z.reshape(B, nz), wl, bl)                     # (B, isz*isz*C0) f32

    # ---- conv_blocks0: BatchNorm2d statistics over the linear output.
    st0 = channel_stats_pallas(x0.reshape(B * isz * isz, C0))
    a0, b0 = _bn_coeffs(st0, B * isz * isz, params["bn0_g"], params["bn0_b"], eps)

    # ---- conv_blocks1: [BN0 + 2x nearest upsample fused] Conv3x3 (+bias) -> stats for BN1.
    w1, c1b = _prep_conv(params["conv1_w"], params["conv1_b"], C0, C1p)
    y1, st1 = conv3x3_fused(x0.reshape(B, isz, isz, C0), a0, b0, w1, c1b,
                            up=2, negative_slope=None)
    a1, b1 = _bn_coeffs(st1, B * (2 * isz) ** 2,
                        _pad_to(params["bn1_g"], C1p), _pad_to(params["bn1_b"], C1p), eps)

    # ---- conv_blocks2: [BN1+LReLU+up2 fused] Conv3x3 -> [BN2+LReLU fused] Conv3x3.
    w2, c2b = _prep_conv(params["conv2_w"], params["conv2_b"], C1p, C2p)
    y2, st2 = conv3x3_fused(y1, a1, b1, w2, c2b, up=2, negative_slope=0.2)
    a2, b2 = _bn_coeffs(st2, B * img_size ** 2,
                        _pad_to(params["bn2_g"], C2p), _pad_to(params["bn2_b"], C2p), eps)

    w3, c3b = _prep_conv(params["conv3_w"], params["conv3_b"], C2p, C3p)
    y3, st3 = conv3x3_fused(y2, a2, b2, w3, c3b, up=1, negative_slope=0.2)

    # ---- final BatchNorm2d(nc, affine=False) + activation (only nc channels written).
    a3, b3 = _bn_coeffs(st3, B * img_size ** 2, None, None, eps)
    # TODO(synk): `activation` is a required ctor arg in PyTorch; tanh (DFME default) assumed.
    out = bn_act_pallas(y3.reshape(B * img_size * img_size, C3p), a3, b3,
                        nc=nc, use_tanh=not pre_x)
    out = out.reshape(B, img_size, img_size, nc)
    return out.transpose(0, 3, 1, 2)                                 # NCHW f32


if __name__ == "__main__":
    # Small batch, real-sized channels/spatial (DFME defaults: ngf=64, img_size=32).
    B, nz, ngf, nc, img_size = 2, 100, 64, 3, 32
    key = jax.random.PRNGKey(0)
    pkey, zkey = jax.random.split(key)
    params = init_params(pkey, nz, ngf, nc, img_size)
    z = jax.random.normal(zkey, (B, nz), jnp.float32)

    out = generator_a_forward(params, z, ngf=ngf, nc=nc, img_size=img_size)
    out = jax.block_until_ready(out)
    assert out.shape == (B, nc, img_size, img_size), out.shape
    assert bool(jnp.all(jnp.isfinite(out)))
    print("KERNEL_OK")
</pallas_src>

<mosaic_0001>
module attributes {stable_mosaic.version = 11 : i64} {
  func.func @_linear_kernel(%arg0: i32, %arg1: memref<2x100xbf16, #tpu.memory_space<vmem>>, %arg2: memref<100x4096xbf16, #tpu.memory_space<vmem>>, %arg3: memref<1x4096xf32, #tpu.memory_space<vmem>>, %arg4: memref<2x4096xf32, #tpu.memory_space<vmem>>) attributes {dimension_semantics = [#tpu.dimension_semantics<parallel>], iteration_bounds = array<i64: 2>, scalar_prefetch = 0 : i64, scratch_operands = 0 : i64, tpu.core_type = #tpu.core_type<tc>, window_params = [{pipeline_mode = #tpu.pipeline_mode<synchronous>, transform_indices = @transform_0, window_bounds = array<i64: 2, 100>}, {transform_indices = @transform_1, window_bounds = array<i64: 100, 4096>}, {transform_indices = @transform_2, window_bounds = array<i64: 1, 4096>}, {transform_indices = @transform_3, window_bounds = array<i64: 2, 4096>}]} {
    %c0 = arith.constant 0 : index
    %c0_0 = arith.constant 0 : index
    %0 = vector.load %arg1[%c0, %c0_0] : memref<2x100xbf16, #tpu.memory_space<vmem>>, vector<2x100xbf16>
    %c0_1 = arith.constant 0 : index
    %c0_2 = arith.constant 0 : index
    %1 = vector.load %arg2[%c0_1, %c0_2] : memref<100x4096xbf16, #tpu.memory_space<vmem>>, vector<100x4096xbf16>
    %cst = arith.constant dense<0.000000e+00> : vector<2x4096xf32>
    %2 = tpu.matmul %0, %1, %cst {dimension_numbers = #tpu.dot_dimension_numbers<[1], [0], [0], [1], [0, 0, 1, 1], [], []>} : vector<2x100xbf16>, vector<100x4096xbf16>, vector<2x4096xf32> -> vector<2x4096xf32>
    %c0_3 = arith.constant 0 : index
    %c0_4 = arith.constant 0 : index
    %3 = vector.load %arg3[%c0_3, %c0_4] : memref<1x4096xf32, #tpu.memory_space<vmem>>, vector<1x4096xf32>
    %4 = vector.broadcast %3 : vector<1x4096xf32> to vector<2x4096xf32>
    %5 = arith.addf %2, %4 : vector<2x4096xf32>
    %c0_5 = arith.constant 0 : index
    %c0_6 = arith.constant 0 : index
    %6 = vector.load %arg4[%c0_5, %c0_6] : memref<2x4096xf32, #tpu.memory_space<vmem>>, vector<2x4096xf32>
    tpu.vector_store %arg4[%c0_5, %c0_6], %5 {strides = array<i32>} : memref<2x4096xf32, #tpu.memory_space<vmem>>, vector<2x4096xf32>,
    return
  }
  func.func @transform_0(%arg0: i32) -> (i32, i32) {
    %c0_i32 = arith.constant 0 : i32
    %c0_i32_0 = arith.constant 0 : i32
    %c0_i32_1 = arith.constant 0 : i32
    return %c0_i32, %c0_i32_0 : i32, i32
  }
  func.func @transform_1(%arg0: i32) -> (i32, i32) {
    %c0_i32 = arith.constant 0 : i32
    %c0_i32_0 = arith.constant 0 : i32
    return %c0_i32, %arg0 : i32, i32
  }
  func.func @transform_2(%arg0: i32) -> (i32, i32) {
    %c0_i32 = arith.constant 0 : i32
    %c0_i32_0 = arith.constant 0 : i32
    return %c0_i32, %arg0 : i32, i32
  }
  func.func @transform_3(%arg0: i32) -> (i32, i32) {
    %c0_i32 = arith.constant 0 : i32
    %c0_i32_0 = arith.constant 0 : i32
    return %c0_i32, %arg0 : i32, i32
  }
}

</mosaic_0001>

<bundles_post_ra>
// kernel: tpu_custom_call.1
= control target key start
LH: loop header
LB: loop body
LE: loop exit
PB: predicated region body
PF: predicated region fallthrough
CT: control target
= control target key end

     0   :  { %s4294_s0 = inlined_call_operand.hbm [shape: bf16[2,100], index: 0, kind: input, shape index: {}]   ;;  %s4295_s1 = inlined_call_operand.hbm [shape: bf16[100,8192], index: 1, kind: input, shape index: {}]   ;;  %s4296_s2 = inlined_call_operand.hbm [shape: f32[1,8192], index: 2, kind: input, shape index: {}]   ;;  %s4297_s3 = inlined_call_operand.hbm [shape: f32[2,8192], index: 3, kind: output, shape index: {}]  }
   0x1   :  { %4298 = sst [smem:[#allocation12_spill]] %s4294_s0 }
   0x2   :  { %8 = vsyncpa [#allocation3], 0 }
   0x3   :  { %9 = vsyncpa [#allocation6], 0 }
   0x4   :  { %11 = vsyncpa [#allocation6 + $0x1], 0 }
   0x5   :  { %12 = vsyncpa [#allocation4], 0 }
   0x6   :  { %14 = vsyncpa [#allocation4 + $0x1], 0  ;;  %s3566_s12 = smov 0   ;;  %s3568_s13 = smov 0  }
   0x7   :  { %s3570_s14 = smov 0   ;;  %s3572_s15 = smov 0  }
   0x8 LB: > { %s3587_s16 = sadd.s32 1, %s3540_s15   ;;  %s48_s17 = sadd.s32 1, %s3536_s14  ;;  %s3540_s15 = sphi %s3572_s15, %s4309_s15   ;;  %s3536_s14 = sphi %s3570_s14, %s4308_s14   ;;  %s3532_s13 = sphi %s3568_s13, %s4307_s13   ;;  %s3528_s12 = sphi %s3566_s12, %s4306_s12  }
   0x9   : > { %s45_s18 = ssub.s32 %s3540_s15, %s3587_s16  ;;  %p55_p0 = scmp.ne.s32.totalorder %s3536_s14, %s3532_s13 }
   0xa   : > { %p46_p1 = scmp.eq.s32.totalorder %s45_s18, 0  ;;  %p56_p2 = scmp.eq.s32.totalorder %s3540_s15, 0 }
   0xb   : > { %p3340_p4 = scmp.lt.s32.totalorder %s3540_s15, 2  ;;  %s149_s20 = sand.u32 1, %s3540_s15  }
   0xc   : > { %s3598_s19 = scalar_select %p46_p1, %s3536_s14, %s48_s17  }
   0xd   : > { %p57_p5 = por %p56_p2, %p55_p0  ;;  %s151_s21 = sand.u32 1, %s3536_s14  }
   0xe   : > { %s3312_s22 = smul.u32 1664, %s151_s21  ;;  %s3118_s23 = sshll.u32 %s3540_s15, 7 }
   0xf   : > { %s158_s26 = scalar_lea.hbm %s4295_s1, %s3118_s23  ;;  %p3611_p6 = pnand %p3340_p4, %p57_p5 }
  0x10   : > { %s159_s28 = sshll.u32 %s158_s26, 4  ;;  %s153_s29 = scalar_lea.vmem [#allocation5], %s3312_s22  ;;  %s160_s28 = int_to_ptr.hbm [resolvable:$true] %s159_s28 }
  0x11   : > { %s161_s30 = sshll.u32 %s153_s29, 4  ;;  %s3615_s4 = scalar_lea.sflag [#allocation6], %s149_s20  ;;  %s162_s30 = int_to_ptr.vmem [resolvable:$true] %s161_s30 }
  0x12   : > { %s3380_s5 = sshra.s32 %s160_s28, 4  ;;  %p3384_p8 = pneg %p3611_p6  ;;  %s3381_s5 = int_to_ptr.hbm [resolvable:$true] %s3380_s5 }
  0x13   : > { %s3382_s6 = scalar_lea.hbm %s3381_s5, 1664  ;;  %s3387_s9 = scalar_lea.hbm %s4295_s1, 3328 }
  0x14   : > { %p3383_p7 = scmp.ne.s32.totalorder %s3381_s5, %s3382_s6  ;;  %p3388_p11 = scmp.lt.s32.totalorder %s3381_s5, %s4295_s1 }
  0x15   : > { %p3389_p12 = scmp.lt.s32.totalorder %s3387_s9, %s3382_s6 }
  0x16   : > { %p3385_p9 = pnand %p3384_p8, %p3383_p7 }
  0x17   : > { %p3390_p13 = por %p3389_p12, %p3388_p11 }
  0x18   : > { %p3386_p10 = pneg %p3385_p9 }
  0x1a   : > { %p3391_p1 = pnand %p3390_p13, %p3386_p10 }
  0x1c   : > { %3394 = shalt.err (!%p3391_p1)
}
  0x1d   : > { %s3542_s17 = smov 4096   ;;  %s3543_s18 = smov 2048  }
  0x1e   : > { %s3544_s20 = smov 128   ;;  %s3632_s22 = sadd.s32 4294967295, %s3540_s15  }
  0x1f   : > { %3331 = dma.hbm_to_vmem [thread:$0]  (!%p3611_p6), %s160_s28, 26624, %s162_s30, %s3615_s4, %s3542_s17, %s3543_s18, %s3544_s20  }
  0x20   : > { %s2301_s23 = sadd.s32 4294967294, %s3540_s15   ;;  %p61_p2 = scmp.ne.s32.totalorder %s3532_s13, %s3528_s12 }
  0x21   : > { %p62_p4 = scmp.eq.s32.totalorder %s3632_s22, 0  ;;  %p111_p5 = scmp.eq.s32.totalorder %s3632_s22, 1 }
  0x22   : > { %p117_p7 = scmp.eq.s32.totalorder %s2301_s23, 1  ;;  %p2302_p9 = scmp.ge.s32.totalorder %s3540_s15, 1 }
  0x23   : > { %p3642_p10 = por %p62_p4, %p61_p2  ;;  %p3649_p11 = por %p111_p5, %p55_p0 }
  0x24   : > { %p3653_p12 = por %p117_p7, %p61_p2  ;;  %p124_p13 = scmp.lt.s32.totalorder %s3540_s15, 3 }
  0x25   : > { %s4303_s0 = sld [smem:[#allocation12_spill]]  ;;  %s2307_s6 = sshll.u32 %s151_s21, 5 }
  0x26   : > { %p3661_p1 = pnand %p2302_p9, %p124_p13  ;;  %s3545_s7 = smov [#allocation2]  }
  0x27   : > { %s138_s8 = sshll.u32 %s3545_s7, 4  ;;  %s2308_s9 = sshll.u32 %s3540_s15, 5  ;;  %s139_s8 = int_to_ptr.vmem [resolvable:$true] %s138_s8 }
  0x28   : > { %p3324_p0 = pneg %p3661_p1  ;;  %s179_s17 = scalar_lea.hbm %s4296_s2, %s2308_s9 }
  0x29   : > { %s175_s18 = scalar_lea.vmem [#allocation7], %s2307_s6  ;;  %s181_s23 = sshll.u32 %s179_s17, 4  ;;  %s182_s23 = int_to_ptr.hbm [resolvable:$true] %s181_s23 }
  0x2a   : > { %p3325_p2 = pnand %p3324_p0, %p62_p4  ;;  %s183_s20 = sshll.u32 %s175_s18, 4  ;;  %s184_s20 = int_to_ptr.vmem [resolvable:$true] %s183_s20 }
  0x2b   : > { %s136_s30 = sshll.u32 %s4303_s0, 4  ;;  %s3440_s21 = sshra.s32 %s182_s23, 4  ;;  %s137_s30 = int_to_ptr.hbm [resolvable:$true] %s136_s30  ;;  %s3441_s21 = int_to_ptr.hbm [resolvable:$true] %s3440_s21 }
  0x2c   : > { %3327 = dma.hbm_to_vmem [thread:$0]  (!%p3325_p2), %s137_s30, 16, %s139_s8, [#allocation3]  }
  0x2d   : > { %s3442_s28 = scalar_lea.hbm %s3441_s21, 32  ;;  %s3447_s0 = scalar_lea.hbm %s4296_s2, 64 }
  0x2e   : > { %p3443_p5 = scmp.ne.s32.totalorder %s3441_s21, %s3442_s28  ;;  %p3448_p13 = scmp.lt.s32.totalorder %s3441_s21, %s4296_s2 }
  0x2f   : > { %p3449_p0 = scmp.lt.s32.totalorder %s3447_s0, %s3442_s28 }
  0x30   : > { %p3445_p7 = pnand %p3443_p5, %p3384_p8 }
  0x31   : > { %p3450_p2 = por %p3449_p0, %p3448_p13 }
  0x32   : > { %p3446_p9 = pneg %p3445_p7 }
  0x34   : > { %p3451_p3 = pnand %p3450_p2, %p3446_p9 }
  0x36   : > { %3454 = shalt.err (!%p3451_p3)
}
  0x37   : > { %3334 = dma.hbm_to_vmem [thread:$0]  (!%p3611_p6), %s182_s23, 512, %s184_s20, %s3615_s4  }
  0x38   : > { %192 = sbr.rel (%p3661_p1) target bundleno = 439 (0x1b7), region = 32 }
  0x3d   : > { %3515 = dma.done.wait (%p62_p4), [#allocation3], 16  }
  0x3e   : > { %3517 = vsyncadd (%p62_p4), [#allocation3], 4294967280  ;;  %s199_s0 = sand.u32 1, %s3632_s22   ;;  %s3695_s30 = sand.u32 1, %s3532_s13  }
  0x3f   : > { %s3313_s6 = smul.u32 1664, %s3695_s30  ;;  %s200_s27 = scalar_lea.sflag [#allocation6], %s199_s0 }
  0x41   : > { %s3698_s8 = scalar_lea.vmem [#allocation5], %s3313_s6 }
  0x42   : > { %3519 = dma.done.wait (%p3642_p10), %s200_s27, 27136  }
  0x43   : > { %3521 = vsyncadd (%p3642_p10), %s200_s27, 4294940160  ;;  %v439_v0 = vld [vmem:[%s3698_s8 + $0x600] sm:$0x33]  ;;  %v440_v1 = vld [vmem:[%s3698_s8 + $0x608] sm:$0x33]  ;;  %vm1571_vm0 = vcmask 1041408  }
  0x44   : > { %v1119_v2 = vunpack.c.l.b16 %v439_v0  ;;  %v1120_v3 = vunpack.c.h.b16 %v439_v0  ;;  %v1121_v4 = vunpack.c.l.b16 %v440_v1  ;;  %v1122_v5 = vunpack.c.h.b16 %v440_v1  ;;  %v2955_v6 = vld [vmem:[%s3698_s8 + $0x500] sm:$0xf]  ;;  %v3279_v12 = vld [vmem:[%s3698_s8 + $0x504] sm:$0xf]  ;;  %v2963_v14 = vld [vmem:[%s3698_s8 + $0x508] sm:$0xf] }
  0x45   : > { %v3295_v7 = vld [vmem:[%s3698_s8 + $0x57c] sm:$0xf0]  ;;  %v2957_v13 = vld [vmem:[%s3698_s8 + $0x580] sm:$0xf0]  ;;  %v3296_v15 = vld [vmem:[%s3698_s8 + $0x584] sm:$0xf0] }
  0x46   : > { %v1343_v8 = vpack.c.b16 %v1119_v2, %v1119_v2  ;;  %v1344_v9 = vpack.c.b16 %v1120_v3, %v1120_v3  ;;  %v1345_v10 = vpack.c.b16 %v1121_v4, %v1121_v4  ;;  %v1346_v11 = vpack.c.b16 %v1122_v5, %v1122_v5  ;;  %v3280_v16 = vld [vmem:[%s3698_s8 + $0x50c] sm:$0xf]  ;;  %v2827_v24 = vld [vmem:[%s3698_s8 + $0x400] sm:$0xf]  ;;  %v3247_v28 = vld [vmem:[%s3698_s8 + $0x404] sm:$0xf] }
  0x47   : > { %v2965_v17 = vld [vmem:[%s3698_s8 + $0x588] sm:$0xf0]  ;;  %v2956_v22 = vor.u32 %v3295_v7, %v2955_v6  ;;  %v2960_v23 = vor.u32 %v3279_v12, %v2957_v13  ;;  %v3263_v25 = vld [vmem:[%s3698_s8 + $0x47c] sm:$0xf0]  ;;  %v2964_v26 = vor.u32 %v3296_v15, %v2963_v14  ;;  %v2829_v29 = vld [vmem:[%s3698_s8 + $0x480] sm:$0xf0] }
  0x48   : > { %v1573_v18 = vsel %vm1571_vm0, %v1343_v8, 0  ;;  %v1576_v19 = vsel %vm1571_vm0, %v1344_v9, 0  ;;  %v1579_v20 = vsel %vm1571_vm0, %v1345_v10, 0  ;;  %v1582_v21 = vsel %vm1571_vm0, %v1346_v11, 0  ;;  %v2835_v30 = vld [vmem:[%s3698_s8 + $0x408] sm:$0xf] }
  0x49   : > { %1669 = vmatpush.bf16.msra.mxu0 %v1573_v18  ;;  %1682 = vmatpush.bf16.msra.mxu1 %v1576_v19  ;;  %v2968_v27 = vor.u32 %v3280_v16, %v2965_v17  ;;  %v3264_v31 = vld [vmem:[%s3698_s8 + $0x484] sm:$0xf0]  ;;  %v3248_v32 = vld [vmem:[%s3698_s8 + $0x40c] sm:$0xf]  ;;  %v2828_v34 = vor.u32 %v3263_v25, %v2827_v24  ;;  %v2832_v35 = vor.u32 %v3247_v28, %v2829_v29  ;;  %v2699_v36 = vld [vmem:[%s3698_s8 + $0x300] sm:$0xf] }
  0x4a   : > { %1695 = vmatpush.bf16.msra.mxu2 %v1579_v20  ;;  %1708 = vmatpush.bf16.msra.mxu3 %v1582_v21  ;;  %v2837_v33 = vld [vmem:[%s3698_s8 + $0x488] sm:$0xf0]  ;;  %v3231_v37 = vld [vmem:[%s3698_s8 + $0x37c] sm:$0xf0]  ;;  %v2836_v38 = vor.u32 %v3264_v31, %v2835_v30  ;;  %v3215_v40 = vld [vmem:[%s3698_s8 + $0x304] sm:$0xf] }
  0x4b   : > { %v2840_v39 = vor.u32 %v3248_v32, %v2837_v33  ;;  %v2701_v41 = vld [vmem:[%s3698_s8 + $0x380] sm:$0xf0]  ;;  %v2707_v42 = vld [vmem:[%s3698_s8 + $0x308] sm:$0xf]  ;;  %v3216_v44 = vld [vmem:[%s3698_s8 + $0x30c] sm:$0xf]  ;;  %v2700_v46 = vor.u32 %v3231_v37, %v2699_v36 }
  0x4c   : > { %v3232_v43 = vld [vmem:[%s3698_s8 + $0x384] sm:$0xf0]  ;;  %v2709_v45 = vld [vmem:[%s3698_s8 + $0x388] sm:$0xf0]  ;;  %v2704_v47 = vor.u32 %v3215_v40, %v2701_v41  ;;  %v2571_v48 = vld [vmem:[%s3698_s8 + $0x200] sm:$0xf] }
  0x4d   : > { %1670 = vmatpush.bf16.msra.mxu0 %v2956_v22  ;;  %1683 = vmatpush.bf16.msra.mxu1 %v2960_v23  ;;  %v3199_v49 = vld [vmem:[%s3698_s8 + $0x27c] sm:$0xf0]  ;;  %v2708_v50 = vor.u32 %v3232_v43, %v2707_v42  ;;  %v2712_v51 = vor.u32 %v3216_v44, %v2709_v45  ;;  %v3183_v52 = vld [vmem:[%s3698_s8 + $0x204] sm:$0xf]  ;;  %v2579_v54 = vld [vmem:[%s3698_s8 + $0x208] sm:$0xf] }
  0x4e   : > { %1696 = vmatpush.bf16.msra.mxu2 %v2964_v26  ;;  %1709 = vmatpush.bf16.msra.mxu3 %v2968_v27  ;;  %v2573_v53 = vld [vmem:[%s3698_s8 + $0x280] sm:$0xf0]  ;;  %v3200_v55 = vld [vmem:[%s3698_s8 + $0x284] sm:$0xf0]  ;;  %v3184_v56 = vld [vmem:[%s3698_s8 + $0x20c] sm:$0xf]  ;;  %v2572_v59 = vor.u32 %v3199_v49, %v2571_v48 }
  0x4f   : > { %v2581_v57 = vld [vmem:[%s3698_s8 + $0x288] sm:$0xf0]  ;;  %v2443_v58 = vld [vmem:[%s3698_s8 + $0x100] sm:$0xf]  ;;  %v2576_v60 = vor.u32 %v3183_v52, %v2573_v53  ;;  %v3151_v62 = vld [vmem:[%s3698_s8 + $0x104] sm:$0xf]  ;;  %v2580_v0 = vor.u32 %v3200_v55, %v2579_v54 }
  0x50   : > { %v3167_v61 = vld [vmem:[%s3698_s8 + $0x17c] sm:$0xf0]  ;;  %v441_v63 = vld [vmem:[%s3698_s8 + $0x610] sm:$0x33]  ;;  %v2584_v1 = vor.u32 %v3184_v56, %v2581_v57  ;;  %v2445_v2 = vld [vmem:[%s3698_s8 + $0x180] sm:$0xf0] }
  0x51   : > { %1671 = vmatpush.bf16.msra.mxu0 %v2828_v34  ;;  %1684 = vmatpush.bf16.msra.mxu1 %v2832_v35  ;;  %v2451_v3 = vld [vmem:[%s3698_s8 + $0x108] sm:$0xf]  ;;  %v442_v4 = vld [vmem:[%s3698_s8 + $0x618] sm:$0x33]  ;;  %v3152_v6 = vld [vmem:[%s3698_s8 + $0x10c] sm:$0xf]  ;;  %v1123_v8 = vunpack.c.l.b16 %v441_v63  ;;  %v1124_v9 = vunpack.c.h.b16 %v441_v63  ;;  %v2444_v10 = vor.u32 %v3167_v61, %v2443_v58  ;;  %v2448_v11 = vor.u32 %v3151_v62, %v2445_v2 }
  0x52   : > { %1697 = vmatpush.bf16.msra.mxu2 %v2836_v38  ;;  %1710 = vmatpush.bf16.msra.mxu3 %v2840_v39  ;;  %v3168_v5 = vld [vmem:[%s3698_s8 + $0x184] sm:$0xf0]  ;;  %v2453_v7 = vld [vmem:[%s3698_s8 + $0x188] sm:$0xf0]  ;;  %v2315_v12 = vld [vmem:[%s3698_s8] sm:$0xf]  ;;  %v1125_v14 = vunpack.c.l.b16 %v442_v4  ;;  %v1126_v15 = vunpack.c.h.b16 %v442_v4 }
  0x53   : > { %v3135_v13 = vld [vmem:[%s3698_s8 + $0x7c] sm:$0xf0]  ;;  %v2452_v16 = vor.u32 %v3168_v5, %v2451_v3  ;;  %v2456_v17 = vor.u32 %v3152_v6, %v2453_v7  ;;  %v3119_v18 = vld [vmem:[%s3698_s8 + $0x4] sm:$0xf]  ;;  %v2323_v20 = vld [vmem:[%s3698_s8 + $0x8] sm:$0xf]  ;;  %v1347_v25 = vpack.c.b16 %v1123_v8, %v1123_v8  ;;  %v1348_v26 = vpack.c.b16 %v1124_v9, %v1124_v9 }
  0x54   : > { %v2317_v19 = vld [vmem:[%s3698_s8 + $0x80] sm:$0xf0]  ;;  %v3136_v21 = vld [vmem:[%s3698_s8 + $0x84] sm:$0xf0]  ;;  %v3120_v22 = vld [vmem:[%s3698_s8 + $0xc] sm:$0xf]  ;;  %v2316_v24 = vor.u32 %v3135_v13, %v2315_v12  ;;  %v1349_v28 = vpack.c.b16 %v1125_v14, %v1125_v14  ;;  %v1350_v29 = vpack.c.b16 %v1126_v15, %v1126_v15 }
  0x55   : > { %1672 = vmatpush.bf16.msra.mxu0 %v2700_v46  ;;  %1685 = vmatpush.bf16.msra.mxu1 %v2704_v47  ;;  %v2325_v23 = vld [vmem:[%s3698_s8 + $0x88] sm:$0xf0]  ;;  %v2320_v27 = vor.u32 %v3119_v18, %v2317_v19  ;;  %v2324_v30 = vor.u32 %v3136_v21, %v2323_v20  ;;  %v2971_v32 = vld [vmem:[%s3698_s8 + $0x510] sm:$0xf]  ;;  %v3281_v34 = vld [vmem:[%s3698_s8 + $0x514] sm:$0xf] }
  0x56   : > { %1698 = vmatpush.bf16.msra.mxu2 %v2708_v50  ;;  %1711 = vmatpush.bf16.msra.mxu3 %v2712_v51  ;;  %v2328_v31 = vor.u32 %v3120_v22, %v2325_v23  ;;  %v3297_v33 = vld [vmem:[%s3698_s8 + $0x58c] sm:$0xf0]  ;;  %v2973_v35 = vld [vmem:[%s3698_s8 + $0x590] sm:$0xf0]  ;;  %v1585_v36 = vsel %vm1571_vm0, %v1347_v25, 0  ;;  %v1588_v37 = vsel %vm1571_vm0, %v1348_v26, 0 }
  0x57   : > { %v2979_v38 = vld [vmem:[%s3698_s8 + $0x518] sm:$0xf]  ;;  %v1591_v40 = vsel %vm1571_vm0, %v1349_v28, 0  ;;  %v1594_v41 = vsel %vm1571_vm0, %v1350_v29, 0  ;;  %v3282_v42 = vld [vmem:[%s3698_s8 + $0x51c] sm:$0xf]  ;;  %v2972_v45 = vor.u32 %v3297_v33, %v2971_v32  ;;  %v2976_v46 = vor.u32 %v3281_v34, %v2973_v35 }
  0x58   : > { %v3298_v39 = vld [vmem:[%s3698_s8 + $0x594] sm:$0xf0]  ;;  %v2981_v43 = vld [vmem:[%s3698_s8 + $0x598] sm:$0xf0]  ;;  %vm1567_vm1 = vcmask 818176   ;;  %s2311_s4 = sshll.u32 %s3695_s30, 5 }
  0x59   : > { %1673 = vmatpush.bf16.msra.mxu0 %v2572_v59  ;;  %1686 = vmatpush.bf16.msra.mxu1 %v2576_v60  ;;  %v3772_v44 = vld [vmem:[#allocation2] sm:$0x1]  ;;  %v2843_v47 = vld [vmem:[%s3698_s8 + $0x410] sm:$0xf]  ;;  %v2980_v49 = vor.u32 %v3298_v39, %v2979_v38  ;;  %v2984_v50 = vor.u32 %v3282_v42, %v2981_v43  ;;  %v3249_v51 = vld [vmem:[%s3698_s8 + $0x414] sm:$0xf] }
  0x5a   : > { %1699 = vmatpush.bf16.msra.mxu2 %v2580_v0  ;;  %1712 = vmatpush.bf16.msra.mxu3 %v2584_v1  ;;  %v3265_v48 = vld [vmem:[%s3698_s8 + $0x48c] sm:$0xf0]  ;;  %v2845_v52 = vld [vmem:[%s3698_s8 + $0x490] sm:$0xf0]  ;;  %v2851_v53 = vld [vmem:[%s3698_s8 + $0x418] sm:$0xf] }
  0x5b   : > { %v3266_v54 = vld [vmem:[%s3698_s8 + $0x494] sm:$0xf0]  ;;  %v3250_v55 = vld [vmem:[%s3698_s8 + $0x41c] sm:$0xf]  ;;  %v2844_v57 = vor.u32 %v3265_v48, %v2843_v47  ;;  %v2848_v58 = vor.u32 %v3249_v51, %v2845_v52  ;;  %v2715_v59 = vld [vmem:[%s3698_s8 + $0x310] sm:$0xf] }
  0x5c   : > { %v2853_v56 = vld [vmem:[%s3698_s8 + $0x498] sm:$0xf0]  ;;  %v3233_v60 = vld [vmem:[%s3698_s8 + $0x38c] sm:$0xf0]  ;;  %v2852_v61 = vor.u32 %v3266_v54, %v2851_v53  ;;  %v3217_v63 = vld [vmem:[%s3698_s8 + $0x314] sm:$0xf] }
  0x5d   : > { %1674 = vmatpush.bf16.msra.mxu0 %v2444_v10  ;;  %1687 = vmatpush.bf16.msra.mxu1 %v2448_v11  ;;  %v2856_v62 = vor.u32 %v3250_v55, %v2853_v56  ;;  %v2717_v0 = vld [vmem:[%s3698_s8 + $0x390] sm:$0xf0]  ;;  %v2723_v1 = vld [vmem:[%s3698_s8 + $0x318] sm:$0xf]  ;;  %v3218_v3 = vld [vmem:[%s3698_s8 + $0x31c] sm:$0xf]  ;;  %v2716_v5 = vor.u32 %v3233_v60, %v2715_v59 }
  0x5e   : > { %1700 = vmatpush.bf16.msra.mxu2 %v2452_v16  ;;  %1713 = vmatpush.bf16.msra.mxu3 %v2456_v17  ;;  %v3234_v2 = vld [vmem:[%s3698_s8 + $0x394] sm:$0xf0]  ;;  %v2725_v4 = vld [vmem:[%s3698_s8 + $0x398] sm:$0xf0]  ;;  %v2720_v6 = vor.u32 %v3217_v63, %v2717_v0  ;;  %v2587_v7 = vld [vmem:[%s3698_s8 + $0x210] sm:$0xf] }
  0x5f   : > { %v3201_v8 = vld [vmem:[%s3698_s8 + $0x28c] sm:$0xf0]  ;;  %v2724_v9 = vor.u32 %v3234_v2, %v2723_v1  ;;  %v2728_v10 = vor.u32 %v3218_v3, %v2725_v4  ;;  %v3185_v11 = vld [vmem:[%s3698_s8 + $0x214] sm:$0xf]  ;;  %v2595_v13 = vld [vmem:[%s3698_s8 + $0x218] sm:$0xf] }
  0x60   : > { %v2589_v12 = vld [vmem:[%s3698_s8 + $0x290] sm:$0xf0]  ;;  %v3202_v14 = vld [vmem:[%s3698_s8 + $0x294] sm:$0xf0]  ;;  %v3186_v15 = vld [vmem:[%s3698_s8 + $0x21c] sm:$0xf]  ;;  %v2588_v18 = vor.u32 %v3201_v8, %v2587_v7 }
  0x61   : > { %1675 = vmatpush.bf16.msra.mxu0 %v2316_v24  ;;  %1688 = vmatpush.bf16.msra.mxu1 %v2320_v27  ;;  %v2597_v16 = vld [vmem:[%s3698_s8 + $0x298] sm:$0xf0]  ;;  %v2459_v17 = vld [vmem:[%s3698_s8 + $0x110] sm:$0xf]  ;;  %v2592_v19 = vor.u32 %v3185_v11, %v2589_v12  ;;  %v3153_v21 = vld [vmem:[%s3698_s8 + $0x114] sm:$0xf]  ;;  %v2596_v23 = vor.u32 %v3202_v14, %v2595_v13 }
  0x62   : > { %1701 = vmatpush.bf16.msra.mxu2 %v2324_v30  ;;  %1714 = vmatpush.bf16.msra.mxu3 %v2328_v31  ;;  %v3169_v20 = vld [vmem:[%s3698_s8 + $0x18c] sm:$0xf0]  ;;  %v443_v22 = vld [vmem:[%s3698_s8 + $0x620] sm:$0x33]  ;;  %v2600_v24 = vor.u32 %v3186_v15, %v2597_v16  ;;  %v2461_v25 = vld [vmem:[%s3698_s8 + $0x190] sm:$0xf0] }
  0x63   : > { %v2467_v26 = vld [vmem:[%s3698_s8 + $0x118] sm:$0xf]  ;;  %v444_v27 = vld [vmem:[%s3698_s8 + $0x628] sm:$0x33]  ;;  %v3154_v29 = vld [vmem:[%s3698_s8 + $0x11c] sm:$0xf]  ;;  %v1127_v31 = vunpack.c.l.b16 %v443_v22  ;;  %v1128_v32 = vunpack.c.h.b16 %v443_v22  ;;  %v2460_v33 = vor.u32 %v3169_v20, %v2459_v17  ;;  %v2464_v34 = vor.u32 %v3153_v21, %v2461_v25 }
  0x64   : > { %3081 = vmatmul.msk.bf16.vlgmr.msra.gmra.mxu0 %vm1567_vm1, %v3772_v44  ;;  %3082 = vmatmul.msk.bf16.vlgmr.msra.gmra.mxu1 %vm1567_vm1, %v3772_v44  ;;  %v3170_v28 = vld [vmem:[%s3698_s8 + $0x194] sm:$0xf0]  ;;  %v2469_v30 = vld [vmem:[%s3698_s8 + $0x198] sm:$0xf0]  ;;  %v2331_v35 = vld [vmem:[%s3698_s8 + $0x10] sm:$0xf]  ;;  %v1130_v38 = vunpack.c.h.b16 %v444_v27 }
  0x65   : > { %1721 = vmatpush.bf16.msrb.mxu0 %v1585_v36  ;;  %1734 = vmatpush.bf16.msrb.mxu1 %v1588_v37  ;;  %v3137_v36 = vld [vmem:[%s3698_s8 + $0x8c] sm:$0xf0]  ;;  %v1129_v37 = vunpack.c.l.b16 %v444_v27  ;;  %v2468_v39 = vor.u32 %v3170_v28, %v2467_v26  ;;  %v2333_v42 = vld [vmem:[%s3698_s8 + $0x90] sm:$0xf0]  ;;  %v2339_v43 = vld [vmem:[%s3698_s8 + $0x18] sm:$0xf] }
  0x66   : > { %1747 = vmatpush.bf16.msrb.mxu2 %v1591_v40  ;;  %1760 = vmatpush.bf16.msrb.mxu3 %v1594_v41  ;;  %v2472_v40 = vor.u32 %v3154_v29, %v2469_v30  ;;  %v3121_v41 = vld [vmem:[%s3698_s8 + $0x14] sm:$0xf]  ;;  %v2341_v47 = vld [vmem:[%s3698_s8 + $0x98] sm:$0xf0]  ;;  %v2332_v48 = vor.u32 %v3137_v36, %v2331_v35  ;;  %v1354_v53 = vpack.c.b16 %v1130_v38, %v1130_v38  ;;  %v2987_v56 = vld [vmem:[%s3698_s8 + $0x520] sm:$0xf] }
  0x67   : > { %3083 = vmatmul.msk.bf16.vlgmr.msra.gmra.mxu2 %vm1567_vm1, %v3772_v44  ;;  %3084 = vmatmul.msk.bf16.vlgmr.msra.gmra.mxu3 %vm1567_vm1, %v3772_v44  ;;  %v2336_v51 = vor.u32 %v3121_v41, %v2333_v42  ;;  %v1353_v52 = vpack.c.b16 %v1129_v37, %v1129_v37  ;;  %v2989_v59 = vld [vmem:[%s3698_s8 + $0x5a0] sm:$0xf0]  ;;  %v3300_v63 = vld [vmem:[%s3698_s8 + $0x5a4] sm:$0xf0]  ;;  %v3284_v2 = vld [vmem:[%s3698_s8 + $0x52c] sm:$0xf] }
  0x68   : > { %v1606_v1 = vsel %vm1571_vm0, %v1354_v53, 0  ;;  %v2997_v3 = vld [vmem:[%s3698_s8 + $0x5a8] sm:$0xf0]  ;;  %v3267_v7 = vld [vmem:[%s3698_s8 + $0x49c] sm:$0xf0]  ;;  %s4075_s24 = scalar_lea.vmem [#allocation7], %s2311_s4 }
  0x69   : > { %1722 = vmatpush.bf16.msrb.mxu0 %v2972_v45  ;;  %1735 = vmatpush.bf16.msrb.mxu1 %v2976_v46  ;;  %v3138_v45 = vld [vmem:[%s3698_s8 + $0x94] sm:$0xf0]  ;;  %v3122_v46 = vld [vmem:[%s3698_s8 + $0x1c] sm:$0xf]  ;;  %v1603_v0 = vsel %vm1571_vm0, %v1353_v52, 0  ;;  %s2312_s5 = sshll.u32 %s3695_s30, 6 }
  0x6a   : > { %1748 = vmatpush.bf16.msrb.mxu2 %v2980_v49  ;;  %1761 = vmatpush.bf16.msrb.mxu3 %v2984_v50  ;;  %v1351_v49 = vpack.c.b16 %v1127_v31, %v1127_v31  ;;  %v1352_v50 = vpack.c.b16 %v1128_v32, %v1128_v32  ;;  %v2340_v54 = vor.u32 %v3138_v45, %v2339_v43  ;;  %v2861_v11 = vld [vmem:[%s3698_s8 + $0x4a0] sm:$0xf0]  ;;  %v2867_v12 = vld [vmem:[%s3698_s8 + $0x428] sm:$0xf]  ;;  %v3252_v14 = vld [vmem:[%s3698_s8 + $0x42c] sm:$0xf] }
  0x6b   : > { %v2344_v55 = vor.u32 %v3122_v46, %v2341_v47  ;;  %v3268_v13 = vld [vmem:[%s3698_s8 + $0x4a4] sm:$0xf0]  ;;  %v2869_v15 = vld [vmem:[%s3698_s8 + $0x4a8] sm:$0xf0]  ;;  %v3219_v22 = vld [vmem:[%s3698_s8 + $0x324] sm:$0xf] }
  0x6c   : > { %v1597_v60 = vsel %vm1571_vm0, %v1351_v49, 0  ;;  %v2868_v20 = vor.u32 %v3268_v13, %v2867_v12  ;;  %v2872_v21 = vor.u32 %v3252_v14, %v2869_v15  ;;  %v3236_v25 = vld [vmem:[%s3698_s8 + $0x3a4] sm:$0xf0]  ;;  %v3220_v26 = vld [vmem:[%s3698_s8 + $0x32c] sm:$0xf]  ;;  %vm2141_vm2 = vcmask 1045508  }
  0x6d   : > { %1723 = vmatpush.bf16.msrb.mxu0 %v2844_v57  ;;  %1736 = vmatpush.bf16.msrb.mxu1 %v2848_v58  ;;  %v3299_v57 = vld [vmem:[%s3698_s8 + $0x59c] sm:$0xf0]  ;;  %v3283_v58 = vld [vmem:[%s3698_s8 + $0x524] sm:$0xf]  ;;  %v2741_v27 = vld [vmem:[%s3698_s8 + $0x3a8] sm:$0xf0] }
  0x6e   : > { %1749 = vmatpush.bf16.msrb.mxu2 %v2852_v61  ;;  %1762 = vmatpush.bf16.msrb.mxu3 %v2856_v62  ;;  %v1600_v61 = vsel %vm1571_vm0, %v1352_v50, 0  ;;  %v2995_v62 = vld [vmem:[%s3698_s8 + $0x528] sm:$0xf]  ;;  %v2988_v4 = vor.u32 %v3299_v57, %v2987_v56  ;;  %v2603_v30 = vld [vmem:[%s3698_s8 + $0x220] sm:$0xf]  ;;  %vm2143_vm3 = vcmask 1043456  }
  0x6f   : > { %v2996_v8 = vor.u32 %v3300_v63, %v2995_v62  ;;  %v3203_v31 = vld [vmem:[%s3698_s8 + $0x29c] sm:$0xf0]  ;;  %v2605_v35 = vld [vmem:[%s3698_s8 + $0x2a0] sm:$0xf0]  ;;  %v2611_v36 = vld [vmem:[%s3698_s8 + $0x228] sm:$0xf] }
  0x70   : > { %v3204_v37 = vld [vmem:[%s3698_s8 + $0x2a4] sm:$0xf0]  ;;  %v3188_v38 = vld [vmem:[%s3698_s8 + $0x22c] sm:$0xf]  ;;  %v2604_v41 = vor.u32 %v3203_v31, %v2603_v30  ;;  %v3171_v43 = vld [vmem:[%s3698_s8 + $0x19c] sm:$0xf0] }
  0x71   : > { %1724 = vmatpush.bf16.msrb.mxu0 %v2716_v5  ;;  %1737 = vmatpush.bf16.msrb.mxu1 %v2720_v6  ;;  %v2992_v5 = vor.u32 %v3283_v58, %v2989_v59  ;;  %v2859_v6 = vld [vmem:[%s3698_s8 + $0x420] sm:$0xf]  ;;  %v3155_v45 = vld [vmem:[%s3698_s8 + $0x124] sm:$0xf]  ;;  %v445_v46 = vld [vmem:[%s3698_s8 + $0x630] sm:$0x33]  ;;  %v2612_v47 = vor.u32 %v3204_v37, %v2611_v36 }
  0x72   : > { %1750 = vmatpush.bf16.msrb.mxu2 %v2724_v9  ;;  %1763 = vmatpush.bf16.msrb.mxu3 %v2728_v10  ;;  %v3000_v9 = vor.u32 %v3284_v2, %v2997_v3  ;;  %v3251_v10 = vld [vmem:[%s3698_s8 + $0x424] sm:$0xf]  ;;  %v2860_v16 = vor.u32 %v3267_v7, %v2859_v6  ;;  %v2483_v50 = vld [vmem:[%s3698_s8 + $0x128] sm:$0xf]  ;;  %v3156_v53 = vld [vmem:[%s3698_s8 + $0x12c] sm:$0xf]  ;;  %v1132_v56 = vunpack.c.h.b16 %v445_v46 }
  0x73   : > { %v2864_v17 = vor.u32 %v3251_v10, %v2861_v11  ;;  %v2477_v49 = vld [vmem:[%s3698_s8 + $0x1a0] sm:$0xf0]  ;;  %v3172_v52 = vld [vmem:[%s3698_s8 + $0x1a4] sm:$0xf0]  ;;  %v2347_v59 = vld [vmem:[%s3698_s8 + $0x20] sm:$0xf] }
  0x74   : > { %v2480_v58 = vor.u32 %v3155_v45, %v2477_v49  ;;  %v2484_v63 = vor.u32 %v3172_v52, %v2483_v50  ;;  %v2349_v2 = vld [vmem:[%s3698_s8 + $0xa0] sm:$0xf0]  ;;  %v2355_v3 = vld [vmem:[%s3698_s8 + $0x28] sm:$0xf]  ;;  %v2357_v6 = vld [vmem:[%s3698_s8 + $0xa8] sm:$0xf0] }
  0x75   : > { %1725 = vmatpush.bf16.msrb.mxu0 %v2588_v18  ;;  %1738 = vmatpush.bf16.msrb.mxu1 %v2592_v19  ;;  %v2731_v18 = vld [vmem:[%s3698_s8 + $0x320] sm:$0xf]  ;;  %v3003_v15 = vld [vmem:[%s3698_s8 + $0x530] sm:$0xf]  ;;  %v3270_v36 = vld [vmem:[%s3698_s8 + $0x4b4] sm:$0xf0] }
  0x76   : > { %1751 = vmatpush.bf16.msrb.mxu2 %v2596_v23  ;;  %1764 = vmatpush.bf16.msrb.mxu3 %v2600_v24  ;;  %v3235_v19 = vld [vmem:[%s3698_s8 + $0x39c] sm:$0xf0]  ;;  %v2733_v23 = vld [vmem:[%s3698_s8 + $0x3a0] sm:$0xf0]  ;;  %v2739_v24 = vld [vmem:[%s3698_s8 + $0x328] sm:$0xf] }
  0x77   : > { %v2732_v28 = vor.u32 %v3235_v19, %v2731_v18  ;;  %v2736_v29 = vor.u32 %v3219_v22, %v2733_v23  ;;  %v2740_v32 = vor.u32 %v3236_v25, %v2739_v24  ;;  %v3005_v18 = vld [vmem:[%s3698_s8 + $0x5b0] sm:$0xf0]  ;;  %v3302_v22 = vld [vmem:[%s3698_s8 + $0x5b4] sm:$0xf0]  ;;  %v3286_v25 = vld [vmem:[%s3698_s8 + $0x53c] sm:$0xf] }
  0x78   : > { %v3269_v30 = vld [vmem:[%s3698_s8 + $0x4ac] sm:$0xf0]  ;;  %v3254_v37 = vld [vmem:[%s3698_s8 + $0x43c] sm:$0xf]  ;;  %v3238_v49 = vld [vmem:[%s3698_s8 + $0x3b4] sm:$0xf0] }
  0x79   : > { %1726 = vmatpush.bf16.msrb.mxu0 %v2460_v33  ;;  %1739 = vmatpush.bf16.msrb.mxu1 %v2464_v34  ;;  %v2744_v33 = vor.u32 %v3220_v26, %v2741_v27  ;;  %v3187_v34 = vld [vmem:[%s3698_s8 + $0x224] sm:$0xf]  ;;  %v3013_v26 = vld [vmem:[%s3698_s8 + $0x5b8] sm:$0xf0]  ;;  %s4136_s11 = scalar_lea.vmem [#allocation8], %s2312_s5  ;;  %s3311_s17 = sshll.u32 %s3632_s22, 6 }
  0x7a   : > { %1752 = vmatpush.bf16.msrb.mxu2 %v2468_v39  ;;  %1765 = vmatpush.bf16.msrb.mxu3 %v2472_v40  ;;  %v2613_v39 = vld [vmem:[%s3698_s8 + $0x2a8] sm:$0xf0]  ;;  %v2475_v40 = vld [vmem:[%s3698_s8 + $0x120] sm:$0xf]  ;;  %v2608_v42 = vor.u32 %v3187_v34, %v2605_v35  ;;  %v2877_v34 = vld [vmem:[%s3698_s8 + $0x4b0] sm:$0xf0]  ;;  %s2194_s23 = scalar_lea.hbm %s4297_s3, %s3311_s17 }
  0x7b   : > { %v2476_v57 = vor.u32 %v3171_v43, %v2475_v40  ;;  %v2883_v35 = vld [vmem:[%s3698_s8 + $0x438] sm:$0xf]  ;;  %v3222_v50 = vld [vmem:[%s3698_s8 + $0x33c] sm:$0xf]  ;;  %s2196_s21 = sshll.u32 %s4136_s11, 4  ;;  %s2198_s22 = sshll.u32 %s2194_s23, 4  ;;  %s2197_s21 = int_to_ptr.vmem [resolvable:$true] %s2196_s21  ;;  %s2199_s22 = int_to_ptr.hbm [resolvable:$true] %s2198_s22 }
  0x7c   : > { %v2884_v43 = vor.u32 %v3270_v36, %v2883_v35  ;;  %s2183_s28 = scalar_lea.sflag [#allocation4], %s3695_s30  ;;  %s3484_s29 = sshra.s32 %s2199_s22, 4  ;;  %s3485_s29 = int_to_ptr.hbm [resolvable:$true] %s3484_s29 }
  0x7d   : > { %1727 = vmatpush.bf16.msrb.mxu0 %v2332_v48  ;;  %1740 = vmatpush.bf16.msrb.mxu1 %v2336_v51  ;;  %v2616_v48 = vor.u32 %v3188_v38, %v2613_v39  ;;  %v446_v51 = vld [vmem:[%s3698_s8 + $0x638] sm:$0x33]  ;;  %s3486_s7 = scalar_lea.hbm %s3485_s29, 64  ;;  %s3490_s0 = scalar_lea.hbm %s4297_s3, 128 }
  0x7e   : > { %1753 = vmatpush.bf16.msrb.mxu2 %v2340_v54  ;;  %1766 = vmatpush.bf16.msrb.mxu3 %v2344_v55  ;;  %v2485_v54 = vld [vmem:[%s3698_s8 + $0x1a8] sm:$0xf0]  ;;  %v1131_v55 = vunpack.c.l.b16 %v445_v46  ;;  %v1134_v62 = vunpack.c.h.b16 %v446_v51  ;;  %v2885_v38 = vld [vmem:[%s3698_s8 + $0x4b8] sm:$0xf0]  ;;  %v3221_v46 = vld [vmem:[%s3698_s8 + $0x334] sm:$0xf]  ;;  %p3487_p3 = scmp.ne.s32.totalorder %s3485_s29, %s3486_s7  ;;  %p3491_p4 = scmp.lt.s32.totalorder %s3485_s29, %s4297_s3 }
  0x7f   : > { %v2888_v45 = vor.u32 %v3254_v37, %v2885_v38  ;;  %p3492_p10 = scmp.lt.s32.totalorder %s3490_s0, %s3486_s7 }
  0x80   : > { %3085 = vmatmul.msk.bf16.vlgmr.msrb.gmra.mxu0 %vm1567_vm1, %v3772_v44  ;;  %3086 = vmatmul.msk.bf16.vlgmr.msrb.gmra.mxu1 %vm1567_vm1, %v3772_v44  ;;  %v1358_v12 = vpack.c.b16 %v1134_v62, %v1134_v62  ;;  %v3190_v62 = vld [vmem:[%s3698_s8 + $0x23c] sm:$0xf]  ;;  %p3488_p6 = pnand %p3487_p3, %p3649_p11 }
  0x81   : > { %1773 = vmatpush.bf16.msra.mxu0 %v1597_v60  ;;  %1786 = vmatpush.bf16.msra.mxu1 %v1600_v61  ;;  %v3139_v60 = vld [vmem:[%s3698_s8 + $0x9c] sm:$0xf0]  ;;  %v1133_v61 = vunpack.c.l.b16 %v446_v51  ;;  %v2757_v51 = vld [vmem:[%s3698_s8 + $0x3b8] sm:$0xf0]  ;;  %p3493_p1 = por %p3492_p10, %p3491_p4 }
  0x82   : > { %1799 = vmatpush.bf16.msra.mxu2 %v1603_v0  ;;  %1812 = vmatpush.bf16.msra.mxu3 %v1606_v1  ;;  %v2488_v0 = vor.u32 %v3156_v53, %v2485_v54  ;;  %v3123_v1 = vld [vmem:[%s3698_s8 + $0x24] sm:$0xf]  ;;  %v2348_v7 = vor.u32 %v3139_v60, %v2347_v59  ;;  %v1618_v24 = vsel %vm1571_vm0, %v1358_v12, 0  ;;  %v2619_v54 = vld [vmem:[%s3698_s8 + $0x230] sm:$0xf]  ;;  %p3489_p8 = pneg %p3488_p6 }
  0x83   : > { %3087 = vmatmul.msk.bf16.vlgmr.msrb.gmra.mxu2 %vm1567_vm1, %v3772_v44  ;;  %3088 = vmatmul.msk.bf16.vlgmr.msrb.gmra.mxu3 %vm1567_vm1, %v3772_v44  ;;  %v2352_v10 = vor.u32 %v3123_v1, %v2349_v2  ;;  %v1357_v11 = vpack.c.b16 %v1133_v61, %v1133_v61  ;;  %v2621_v59 = vld [vmem:[%s3698_s8 + $0x2b0] sm:$0xf0]  ;;  %v2627_v60 = vld [vmem:[%s3698_s8 + $0x238] sm:$0xf]  ;;  %v448_v1 = vld [vmem:[%s3698_s8 + $0x648] sm:$0x33] }
  0x84   : > { %v3206_v61 = vld [vmem:[%s3698_s8 + $0x2b4] sm:$0xf0]  ;;  %p3494_p5 = pnand %p3493_p1, %p3489_p8 }
  0x85   : > { %1774 = vmatpush.bf16.msra.mxu0 %v2988_v4  ;;  %1787 = vmatpush.bf16.msra.mxu1 %v2992_v5  ;;  %v3140_v4 = vld [vmem:[%s3698_s8 + $0xa4] sm:$0xf0]  ;;  %v3124_v5 = vld [vmem:[%s3698_s8 + $0x2c] sm:$0xf]  ;;  %v1615_v23 = vsel %vm1571_vm0, %v1357_v11, 0 }
  0x86   : > { %1800 = vmatpush.bf16.msra.mxu2 %v2996_v8  ;;  %1813 = vmatpush.bf16.msra.mxu3 %v3000_v9  ;;  %v1355_v8 = vpack.c.b16 %v1131_v55, %v1131_v55  ;;  %v1356_v9 = vpack.c.b16 %v1132_v56, %v1132_v56  ;;  %v2356_v13 = vor.u32 %v3140_v4, %v2355_v3  ;;  %v3205_v55 = vld [vmem:[%s3698_s8 + $0x2ac] sm:$0xf0]  ;;  %v3189_v56 = vld [vmem:[%s3698_s8 + $0x234] sm:$0xf]  ;;  %v3174_v11 = vld [vmem:[%s3698_s8 + $0x1b4] sm:$0xf0] }
  0x87   : > { %v2360_v14 = vor.u32 %v3124_v5, %v2357_v6  ;;  %v2620_v2 = vor.u32 %v3205_v55, %v2619_v54  ;;  %v2624_v3 = vor.u32 %v3189_v56, %v2621_v59  ;;  %v2491_v4 = vld [vmem:[%s3698_s8 + $0x130] sm:$0xf]  ;;  %v3157_v6 = vld [vmem:[%s3698_s8 + $0x134] sm:$0xf]  ;;  %v3271_v54 = vld [vmem:[%s3698_s8 + $0x4bc] sm:$0xf0] }
  0x88   : > { %v1609_v19 = vsel %vm1571_vm0, %v1355_v8, 0  ;;  %v3173_v5 = vld [vmem:[%s3698_s8 + $0x1ac] sm:$0xf0]  ;;  %v2899_v59 = vld [vmem:[%s3698_s8 + $0x448] sm:$0xf] }
  0x89   : > { %1775 = vmatpush.bf16.msra.mxu0 %v2860_v16  ;;  %1788 = vmatpush.bf16.msra.mxu1 %v2864_v17  ;;  %v3301_v16 = vld [vmem:[%s3698_s8 + $0x5ac] sm:$0xf0]  ;;  %v3285_v17 = vld [vmem:[%s3698_s8 + $0x534] sm:$0xf] }
  0x8a   : > { %1801 = vmatpush.bf16.msra.mxu2 %v2868_v20  ;;  %1814 = vmatpush.bf16.msra.mxu3 %v2872_v21  ;;  %v1612_v20 = vsel %vm1571_vm0, %v1356_v9, 0  ;;  %v3011_v21 = vld [vmem:[%s3698_s8 + $0x538] sm:$0xf]  ;;  %v3004_v27 = vor.u32 %v3301_v16, %v3003_v15  ;;  %v2493_v9 = vld [vmem:[%s3698_s8 + $0x1b0] sm:$0xf0]  ;;  %v1137_v16 = vunpack.c.l.b16 %v448_v1 }
  0x8b   : > { %v3012_v31 = vor.u32 %v3302_v22, %v3011_v21  ;;  %v2501_v15 = vld [vmem:[%s3698_s8 + $0x1b8] sm:$0xf0]  ;;  %v2363_v21 = vld [vmem:[%s3698_s8 + $0x30] sm:$0xf] }
  0x8c   : > { %v3141_v22 = vld [vmem:[%s3698_s8 + $0xac] sm:$0xf0] }
  0x8d   : > { %1776 = vmatpush.bf16.msra.mxu0 %v2732_v28  ;;  %1789 = vmatpush.bf16.msra.mxu1 %v2736_v29  ;;  %v3008_v28 = vor.u32 %v3285_v17, %v3005_v18  ;;  %v2875_v29 = vld [vmem:[%s3698_s8 + $0x430] sm:$0xf]  ;;  %v1138_v17 = vunpack.c.h.b16 %v448_v1  ;;  %v2492_v18 = vor.u32 %v3173_v5, %v2491_v4  ;;  %v2763_v1 = vld [vmem:[%s3698_s8 + $0x340] sm:$0xf]  ;;  %v3223_v5 = vld [vmem:[%s3698_s8 + $0x344] sm:$0xf] }
  0x8e   : > { %1802 = vmatpush.bf16.msra.mxu2 %v2740_v32  ;;  %1815 = vmatpush.bf16.msra.mxu3 %v2744_v33  ;;  %v3016_v32 = vor.u32 %v3286_v25, %v3013_v26  ;;  %v3253_v33 = vld [vmem:[%s3698_s8 + $0x434] sm:$0xf]  ;;  %v2876_v39 = vor.u32 %v3269_v30, %v2875_v29  ;;  %v2371_v26 = vld [vmem:[%s3698_s8 + $0x38] sm:$0xf]  ;;  %v3126_v30 = vld [vmem:[%s3698_s8 + $0x3c] sm:$0xf] }
  0x8f   : > { %v2880_v40 = vor.u32 %v3253_v33, %v2877_v34  ;;  %v2365_v25 = vld [vmem:[%s3698_s8 + $0xb0] sm:$0xf0]  ;;  %v3142_v29 = vld [vmem:[%s3698_s8 + $0xb4] sm:$0xf0]  ;;  %v1362_v33 = vpack.c.b16 %v1138_v17, %v1138_v17  ;;  %v2364_v34 = vor.u32 %v3141_v22, %v2363_v21  ;;  %v3192_v21 = vld [vmem:[%s3698_s8 + $0x24c] sm:$0xf] }
  0x90   : > { %v2372_v36 = vor.u32 %v3142_v29, %v2371_v26  ;;  %v2645_v22 = vld [vmem:[%s3698_s8 + $0x2c8] sm:$0xf0]  ;;  %v3159_v29 = vld [vmem:[%s3698_s8 + $0x144] sm:$0xf] }
  0x91   : > { %1777 = vmatpush.bf16.msra.mxu0 %v2604_v41  ;;  %1790 = vmatpush.bf16.msra.mxu1 %v2608_v42  ;;  %v2747_v41 = vld [vmem:[%s3698_s8 + $0x330] sm:$0xf] }
  0x92   : > { %1803 = vmatpush.bf16.msra.mxu2 %v2612_v47  ;;  %1816 = vmatpush.bf16.msra.mxu3 %v2616_v48  ;;  %v3237_v42 = vld [vmem:[%s3698_s8 + $0x3ac] sm:$0xf0]  ;;  %v2749_v47 = vld [vmem:[%s3698_s8 + $0x3b0] sm:$0xf0]  ;;  %v2755_v48 = vld [vmem:[%s3698_s8 + $0x338] sm:$0xf] }
  0x93   : > { %v2748_v52 = vor.u32 %v3237_v42, %v2747_v41  ;;  %v2752_v53 = vor.u32 %v3221_v46, %v2749_v47  ;;  %v1630_v41 = vsel %vm1571_vm0, %v1362_v33, 0  ;;  %v3019_v42 = vld [vmem:[%s3698_s8 + $0x540] sm:$0xf]  ;;  %v3021_v46 = vld [vmem:[%s3698_s8 + $0x5c0] sm:$0xf0] }
  0x94   : > { %v3027_v47 = vld [vmem:[%s3698_s8 + $0x548] sm:$0xf] }
  0x95   : > { %1778 = vmatpush.bf16.msra.mxu0 %v2476_v57  ;;  %1791 = vmatpush.bf16.msra.mxu1 %v2480_v58  ;;  %v2756_v57 = vor.u32 %v3238_v49, %v2755_v48  ;;  %v2760_v58 = vor.u32 %v3222_v50, %v2757_v51  ;;  %v3304_v48 = vld [vmem:[%s3698_s8 + $0x5c4] sm:$0xf0]  ;;  %v3288_v49 = vld [vmem:[%s3698_s8 + $0x54c] sm:$0xf] }
  0x96   : > { %1804 = vmatpush.bf16.msra.mxu2 %v2484_v63  ;;  %1817 = vmatpush.bf16.msra.mxu3 %v2488_v0  ;;  %v2629_v63 = vld [vmem:[%s3698_s8 + $0x2b8] sm:$0xf0]  ;;  %v447_v0 = vld [vmem:[%s3698_s8 + $0x640] sm:$0x33]  ;;  %v3029_v50 = vld [vmem:[%s3698_s8 + $0x5c8] sm:$0xf0]  ;;  %v3028_v55 = vor.u32 %v3304_v48, %v3027_v47 }
  0x97   : > { %v2632_v8 = vor.u32 %v3190_v62, %v2629_v63  ;;  %v1135_v12 = vunpack.c.l.b16 %v447_v0  ;;  %v3032_v56 = vor.u32 %v3288_v49, %v3029_v50  ;;  %v2901_v62 = vld [vmem:[%s3698_s8 + $0x4c8] sm:$0xf0]  ;;  %v2515_v33 = vld [vmem:[%s3698_s8 + $0x148] sm:$0xf]  ;;  %v3127_v48 = vld [vmem:[%s3698_s8 + $0x44] sm:$0xf] }
  0x98   : > { %v2381_v49 = vld [vmem:[%s3698_s8 + $0xc0] sm:$0xf0]  ;;  %v2387_v50 = vld [vmem:[%s3698_s8 + $0x48] sm:$0xf] }
  0x99   : > { %1779 = vmatpush.bf16.msra.mxu0 %v2348_v7  ;;  %1792 = vmatpush.bf16.msra.mxu1 %v2352_v10  ;;  %v2628_v7 = vor.u32 %v3206_v61, %v2627_v60  ;;  %v2499_v10 = vld [vmem:[%s3698_s8 + $0x138] sm:$0xf]  ;;  %v3272_v60 = vld [vmem:[%s3698_s8 + $0x4c4] sm:$0xf0]  ;;  %v3256_v61 = vld [vmem:[%s3698_s8 + $0x44c] sm:$0xf] }
  0x9a   : > { %1805 = vmatpush.bf16.msra.mxu2 %v2356_v13  ;;  %1818 = vmatpush.bf16.msra.mxu3 %v2360_v14  ;;  %v1136_v13 = vunpack.c.h.b16 %v447_v0  ;;  %v3158_v14 = vld [vmem:[%s3698_s8 + $0x13c] sm:$0xf]  ;;  %v2904_v4 = vor.u32 %v3256_v61, %v2901_v62 }
  0x9c   : > { %3089 = vmatmul.msk.bf16.vlgmr.msra.gmra.mxu0 %vm1567_vm1, %v3772_v44  ;;  %3090 = vmatmul.msk.bf16.vlgmr.msra.gmra.mxu1 %vm1567_vm1, %v3772_v44 }
  0x9d   : > { %1825 = vmatpush.bf16.msrb.mxu0 %v1609_v19  ;;  %1838 = vmatpush.bf16.msrb.mxu1 %v1612_v20  ;;  %v2496_v19 = vor.u32 %v3157_v6, %v2493_v9  ;;  %v2500_v20 = vor.u32 %v3174_v11, %v2499_v10  ;;  %v2765_v6 = vld [vmem:[%s3698_s8 + $0x3c0] sm:$0xf0]  ;;  %v3224_v9 = vld [vmem:[%s3698_s8 + $0x34c] sm:$0xf] }
  0x9e   : > { %1851 = vmatpush.bf16.msrb.mxu2 %v1615_v23  ;;  %1864 = vmatpush.bf16.msrb.mxu3 %v1618_v24  ;;  %v2504_v23 = vor.u32 %v3158_v14, %v2501_v15  ;;  %v3125_v24 = vld [vmem:[%s3698_s8 + $0x34] sm:$0xf]  ;;  %v2773_v10 = vld [vmem:[%s3698_s8 + $0x3c8] sm:$0xf0]  ;;  %v3207_v14 = vld [vmem:[%s3698_s8 + $0x2bc] sm:$0xf0] }
  0x9f   : > { %3091 = vmatmul.msk.bf16.vlgmr.msra.gmra.mxu2 %vm1567_vm1, %v3772_v44  ;;  %3092 = vmatmul.msk.bf16.vlgmr.msra.gmra.mxu3 %vm1567_vm1, %v3772_v44  ;;  %v2368_v35 = vor.u32 %v3125_v24, %v2365_v25  ;;  %v3191_v15 = vld [vmem:[%s3698_s8 + $0x244] sm:$0xf]  ;;  %v2776_v17 = vor.u32 %v3224_v9, %v2773_v10  ;;  %v450_v24 = vld [vmem:[%s3698_s8 + $0x658] sm:$0x33] }
  0xa0   : > { %v3045_v9 = vld [vmem:[%s3698_s8 + $0x5d8] sm:$0xf0] }
  0xa1   : > { %1826 = vmatpush.bf16.msrb.mxu0 %v3004_v27  ;;  %1839 = vmatpush.bf16.msrb.mxu1 %v3008_v28  ;;  %v1359_v27 = vpack.c.b16 %v1135_v12, %v1135_v12  ;;  %v1360_v28 = vpack.c.b16 %v1136_v13, %v1136_v13  ;;  %v2768_v12 = vor.u32 %v3223_v5, %v2765_v6  ;;  %v2635_v13 = vld [vmem:[%s3698_s8 + $0x240] sm:$0xf]  ;;  %v3037_v5 = vld [vmem:[%s3698_s8 + $0x5d0] sm:$0xf0]  ;;  %v3043_v6 = vld [vmem:[%s3698_s8 + $0x558] sm:$0xf] }
  0xa2   : > { %1852 = vmatpush.bf16.msrb.mxu2 %v3012_v31  ;;  %1865 = vmatpush.bf16.msrb.mxu3 %v3016_v32  ;;  %v2373_v31 = vld [vmem:[%s3698_s8 + $0xb8] sm:$0xf0]  ;;  %v1361_v32 = vpack.c.b16 %v1137_v16, %v1137_v16  ;;  %v2636_v25 = vor.u32 %v3207_v14, %v2635_v13  ;;  %v3273_v13 = vld [vmem:[%s3698_s8 + $0x4cc] sm:$0xf0] }
  0xa3   : > { %v2376_v37 = vor.u32 %v3126_v30, %v2373_v31  ;;  %v1621_v38 = vsel %vm1571_vm0, %v1359_v27, 0  ;;  %v2507_v27 = vld [vmem:[%s3698_s8 + $0x140] sm:$0xf]  ;;  %v2648_v31 = vor.u32 %v3192_v21, %v2645_v22  ;;  %v2917_v21 = vld [vmem:[%s3698_s8 + $0x4d8] sm:$0xf0] }
  0xa5   : > { %1827 = vmatpush.bf16.msrb.mxu0 %v2876_v39  ;;  %1840 = vmatpush.bf16.msrb.mxu1 %v2880_v40  ;;  %v1624_v39 = vsel %vm1571_vm0, %v1360_v28, 0  ;;  %v1627_v40 = vsel %vm1571_vm0, %v1361_v32, 0  ;;  %v3175_v28 = vld [vmem:[%s3698_s8 + $0x1bc] sm:$0xf0]  ;;  %v2509_v32 = vld [vmem:[%s3698_s8 + $0x1c0] sm:$0xf0] }
  0xa6   : > { %1853 = vmatpush.bf16.msrb.mxu2 %v2884_v43  ;;  %1866 = vmatpush.bf16.msrb.mxu3 %v2888_v45  ;;  %v3303_v43 = vld [vmem:[%s3698_s8 + $0x5bc] sm:$0xf0]  ;;  %v3287_v45 = vld [vmem:[%s3698_s8 + $0x544] sm:$0xf] }
  0xa7   : > { %v3020_v51 = vor.u32 %v3303_v43, %v3019_v42  ;;  %v2512_v42 = vor.u32 %v3159_v29, %v2509_v32  ;;  %v2781_v29 = vld [vmem:[%s3698_s8 + $0x3d0] sm:$0xf0]  ;;  %v2789_v32 = vld [vmem:[%s3698_s8 + $0x3d8] sm:$0xf0] }
  0xa9   : > { %1828 = vmatpush.bf16.msrb.mxu0 %v2748_v52  ;;  %1841 = vmatpush.bf16.msrb.mxu1 %v2752_v53  ;;  %v3024_v52 = vor.u32 %v3287_v45, %v3021_v46  ;;  %v2891_v53 = vld [vmem:[%s3698_s8 + $0x440] sm:$0xf] }
  0xaa   : > { %1854 = vmatpush.bf16.msrb.mxu2 %v2756_v57  ;;  %1867 = vmatpush.bf16.msrb.mxu3 %v2760_v58  ;;  %v3255_v57 = vld [vmem:[%s3698_s8 + $0x444] sm:$0xf]  ;;  %v2892_v63 = vor.u32 %v3271_v54, %v2891_v53  ;;  %v2379_v45 = vld [vmem:[%s3698_s8 + $0x40] sm:$0xf]  ;;  %v3144_v53 = vld [vmem:[%s3698_s8 + $0xc4] sm:$0xf0] }
  0xab   : > { %v2893_v58 = vld [vmem:[%s3698_s8 + $0x4c0] sm:$0xf0]  ;;  %v3143_v46 = vld [vmem:[%s3698_s8 + $0xbc] sm:$0xf0]  ;;  %v3128_v54 = vld [vmem:[%s3698_s8 + $0x4c] sm:$0xf] }
  0xac   : > { %v2896_v0 = vor.u32 %v3255_v57, %v2893_v58  ;;  %v2380_v58 = vor.u32 %v3143_v46, %v2379_v45  ;;  %v2661_v45 = vld [vmem:[%s3698_s8 + $0x2d8] sm:$0xf0]  ;;  %v451_v46 = vld [vmem:[%s3698_s8 + $0x660] sm:$0x33] }
  0xad   : > { %1829 = vmatpush.bf16.msrb.mxu0 %v2620_v2  ;;  %1842 = vmatpush.bf16.msrb.mxu1 %v2624_v3  ;;  %v3239_v2 = vld [vmem:[%s3698_s8 + $0x3bc] sm:$0xf0]  ;;  %v2900_v3 = vor.u32 %v3272_v60, %v2899_v59  ;;  %v2384_v59 = vor.u32 %v3127_v48, %v2381_v49  ;;  %v2388_v60 = vor.u32 %v3144_v53, %v2387_v50  ;;  %v2523_v48 = vld [vmem:[%s3698_s8 + $0x150] sm:$0xf]  ;;  %v3161_v53 = vld [vmem:[%s3698_s8 + $0x154] sm:$0xf] }
  0xae   : > { %1855 = vmatpush.bf16.msrb.mxu2 %v2628_v7  ;;  %1868 = vmatpush.bf16.msrb.mxu3 %v2632_v8  ;;  %v2771_v7 = vld [vmem:[%s3698_s8 + $0x348] sm:$0xf]  ;;  %v2764_v11 = vor.u32 %v3239_v2, %v2763_v1  ;;  %v3035_v2 = vld [vmem:[%s3698_s8 + $0x550] sm:$0xf] }
  0xaf   : > { %v3240_v8 = vld [vmem:[%s3698_s8 + $0x3c4] sm:$0xf0]  ;;  %v3177_v49 = vld [vmem:[%s3698_s8 + $0x1cc] sm:$0xf0] }
  0xb0   : > { %v2772_v16 = vor.u32 %v3240_v8, %v2771_v7  ;;  %v3306_v7 = vld [vmem:[%s3698_s8 + $0x5d4] sm:$0xf0]  ;;  %v3290_v8 = vld [vmem:[%s3698_s8 + $0x55c] sm:$0xf] }
  0xb1   : > { %1830 = vmatpush.bf16.msrb.mxu0 %v2492_v18  ;;  %1843 = vmatpush.bf16.msrb.mxu1 %v2496_v19  ;;  %v2637_v18 = vld [vmem:[%s3698_s8 + $0x2c0] sm:$0xf0]  ;;  %v2643_v19 = vld [vmem:[%s3698_s8 + $0x248] sm:$0xf]  ;;  %v3044_v14 = vor.u32 %v3306_v7, %v3043_v6  ;;  %v2397_v6 = vld [vmem:[%s3698_s8 + $0xd0] sm:$0xf0] }
  0xb2   : > { %1856 = vmatpush.bf16.msrb.mxu2 %v2500_v20  ;;  %1869 = vmatpush.bf16.msrb.mxu3 %v2504_v23  ;;  %v3208_v20 = vld [vmem:[%s3698_s8 + $0x2c4] sm:$0xf0]  ;;  %v449_v23 = vld [vmem:[%s3698_s8 + $0x650] sm:$0x33]  ;;  %v2640_v26 = vor.u32 %v3191_v15, %v2637_v18  ;;  %v3048_v15 = vor.u32 %v3290_v8, %v3045_v9  ;;  %v2915_v18 = vld [vmem:[%s3698_s8 + $0x458] sm:$0xf] }
  0xb3   : > { %v2644_v30 = vor.u32 %v3208_v20, %v2643_v19  ;;  %v3274_v19 = vld [vmem:[%s3698_s8 + $0x4d4] sm:$0xf0]  ;;  %v3258_v20 = vld [vmem:[%s3698_s8 + $0x45c] sm:$0xf] }
  0xb4   : > { %v2403_v7 = vld [vmem:[%s3698_s8 + $0x58] sm:$0xf] }
  0xb5   : > { %1831 = vmatpush.bf16.msrb.mxu0 %v2364_v34  ;;  %1844 = vmatpush.bf16.msrb.mxu1 %v2368_v35  ;;  %v3176_v34 = vld [vmem:[%s3698_s8 + $0x1c4] sm:$0xf0]  ;;  %v1139_v35 = vunpack.c.l.b16 %v449_v23  ;;  %v3146_v9 = vld [vmem:[%s3698_s8 + $0xd4] sm:$0xf0] }
  0xb6   : > { %1857 = vmatpush.bf16.msrb.mxu2 %v2372_v36  ;;  %1870 = vmatpush.bf16.msrb.mxu3 %v2376_v37  ;;  %v1140_v36 = vunpack.c.h.b16 %v449_v23  ;;  %v3160_v37 = vld [vmem:[%s3698_s8 + $0x14c] sm:$0xf]  ;;  %v2516_v43 = vor.u32 %v3176_v34, %v2515_v33  ;;  %v2651_v33 = vld [vmem:[%s3698_s8 + $0x250] sm:$0xf] }
  0xb8   : > { %3093 = vmatmul.msk.bf16.vlgmr.msrb.gmra.mxu0 %vm1567_vm1, %v3772_v44  ;;  %3094 = vmatmul.msk.bf16.vlgmr.msrb.gmra.mxu1 %vm1567_vm1, %v3772_v44 }
  0xb9   : > { %1877 = vmatpush.bf16.msra.mxu0 %v1621_v38  ;;  %1890 = vmatpush.bf16.msra.mxu1 %v1624_v39  ;;  %v2517_v38 = vld [vmem:[%s3698_s8 + $0x1c8] sm:$0xf0]  ;;  %v1141_v39 = vunpack.c.l.b16 %v450_v24 }
  0xba   : > { %1903 = vmatpush.bf16.msra.mxu2 %v1627_v40  ;;  %1916 = vmatpush.bf16.msra.mxu3 %v1630_v41  ;;  %v1142_v40 = vunpack.c.h.b16 %v450_v24  ;;  %v2508_v41 = vor.u32 %v3175_v28, %v2507_v27  ;;  %v2520_v47 = vor.u32 %v3160_v37, %v2517_v38  ;;  %v2779_v24 = vld [vmem:[%s3698_s8 + $0x350] sm:$0xf]  ;;  %v2920_v27 = vor.u32 %v3258_v20, %v2917_v21  ;;  %v3225_v28 = vld [vmem:[%s3698_s8 + $0x354] sm:$0xf] }
  0xbb   : > { %3095 = vmatmul.msk.bf16.vlgmr.msrb.gmra.mxu2 %vm1567_vm1, %v3772_v44  ;;  %3096 = vmatmul.msk.bf16.vlgmr.msrb.gmra.mxu3 %vm1567_vm1, %v3772_v44  ;;  %v3193_v37 = vld [vmem:[%s3698_s8 + $0x254] sm:$0xf] }
  0xbc   : > { %v1366_v57 = vpack.c.b16 %v1142_v40, %v1142_v40  ;;  %v2653_v38 = vld [vmem:[%s3698_s8 + $0x2d0] sm:$0xf0] }
  0xbd   : > { %1878 = vmatpush.bf16.msra.mxu0 %v3020_v51  ;;  %1891 = vmatpush.bf16.msra.mxu1 %v3024_v52  ;;  %v1363_v51 = vpack.c.b16 %v1139_v35, %v1139_v35  ;;  %v1364_v52 = vpack.c.b16 %v1140_v36, %v1140_v36  ;;  %v2784_v35 = vor.u32 %v3225_v28, %v2781_v29  ;;  %v3209_v36 = vld [vmem:[%s3698_s8 + $0x2cc] sm:$0xf0]  ;;  %v3053_v28 = vld [vmem:[%s3698_s8 + $0x5e0] sm:$0xf0]  ;;  %v3059_v29 = vld [vmem:[%s3698_s8 + $0x568] sm:$0xf] }
  0xbe   : > { %1904 = vmatpush.bf16.msra.mxu2 %v3028_v55  ;;  %1917 = vmatpush.bf16.msra.mxu3 %v3032_v56  ;;  %v2389_v55 = vld [vmem:[%s3698_s8 + $0xc8] sm:$0xf0]  ;;  %v1365_v56 = vpack.c.b16 %v1141_v39, %v1141_v39  ;;  %v1642_v1 = vsel %vm1571_vm0, %v1366_v57, 0  ;;  %v2652_v50 = vor.u32 %v3209_v36, %v2651_v33  ;;  %v3178_v57 = vld [vmem:[%s3698_s8 + $0x1d4] sm:$0xf0] }
  0xbf   : > { %v2392_v61 = vor.u32 %v3128_v54, %v2389_v55  ;;  %v1633_v62 = vsel %vm1571_vm0, %v1363_v51, 0  ;;  %v2656_v51 = vor.u32 %v3193_v37, %v2653_v38  ;;  %v2525_v54 = vld [vmem:[%s3698_s8 + $0x1d0] sm:$0xf0]  ;;  %v2531_v55 = vld [vmem:[%s3698_s8 + $0x158] sm:$0xf] }
  0xc0   : > { %v2923_v36 = vld [vmem:[%s3698_s8 + $0x460] sm:$0xf] }
  0xc1   : > { %1879 = vmatpush.bf16.msra.mxu0 %v2892_v63  ;;  %1892 = vmatpush.bf16.msra.mxu1 %v2896_v0  ;;  %v1636_v63 = vsel %vm1571_vm0, %v1364_v52, 0  ;;  %v1639_v0 = vsel %vm1571_vm0, %v1365_v56, 0 }
  0xc2   : > { %1905 = vmatpush.bf16.msra.mxu2 %v2900_v3  ;;  %1918 = vmatpush.bf16.msra.mxu3 %v2904_v4  ;;  %v3305_v3 = vld [vmem:[%s3698_s8 + $0x5cc] sm:$0xf0]  ;;  %v3289_v4 = vld [vmem:[%s3698_s8 + $0x554] sm:$0xf] }
  0xc3   : > { %v3036_v10 = vor.u32 %v3305_v3, %v3035_v2  ;;  %v2528_v2 = vor.u32 %v3161_v53, %v2525_v54  ;;  %v2532_v3 = vor.u32 %v3178_v57, %v2531_v55  ;;  %v3243_v57 = vld [vmem:[%s3698_s8 + $0x3dc] sm:$0xf0] }
  0xc5   : > { %1880 = vmatpush.bf16.msra.mxu0 %v2764_v11  ;;  %1893 = vmatpush.bf16.msra.mxu1 %v2768_v12  ;;  %v3040_v11 = vor.u32 %v3289_v4, %v3037_v5  ;;  %v2907_v12 = vld [vmem:[%s3698_s8 + $0x450] sm:$0xf]  ;;  %v3129_v5 = vld [vmem:[%s3698_s8 + $0x54] sm:$0xf] }
  0xc6   : > { %1906 = vmatpush.bf16.msra.mxu2 %v2772_v16  ;;  %1919 = vmatpush.bf16.msra.mxu3 %v2776_v17  ;;  %v3257_v16 = vld [vmem:[%s3698_s8 + $0x454] sm:$0xf]  ;;  %v2908_v22 = vor.u32 %v3273_v13, %v2907_v12 }
  0xc7   : > { %v2909_v17 = vld [vmem:[%s3698_s8 + $0x4d0] sm:$0xf0] }
  0xc8   : > { %v2912_v23 = vor.u32 %v3257_v16, %v2909_v17  ;;  %v2400_v17 = vor.u32 %v3129_v5, %v2397_v6  ;;  %v3228_v5 = vld [vmem:[%s3698_s8 + $0x36c] sm:$0xf] }
  0xc9   : > { %1881 = vmatpush.bf16.msra.mxu0 %v2636_v25  ;;  %1894 = vmatpush.bf16.msra.mxu1 %v2640_v26  ;;  %v3241_v25 = vld [vmem:[%s3698_s8 + $0x3cc] sm:$0xf0]  ;;  %v2916_v26 = vor.u32 %v3274_v19, %v2915_v18  ;;  %v2404_v18 = vor.u32 %v3146_v9, %v2403_v7  ;;  %v2805_v6 = vld [vmem:[%s3698_s8 + $0x3e8] sm:$0xf0] }
  0xca   : > { %1907 = vmatpush.bf16.msra.mxu2 %v2644_v30  ;;  %1920 = vmatpush.bf16.msra.mxu3 %v2648_v31  ;;  %v2787_v30 = vld [vmem:[%s3698_s8 + $0x358] sm:$0xf]  ;;  %v3226_v31 = vld [vmem:[%s3698_s8 + $0x35c] sm:$0xf]  ;;  %v2780_v34 = vor.u32 %v3241_v25, %v2779_v24  ;;  %v3051_v25 = vld [vmem:[%s3698_s8 + $0x560] sm:$0xf] }
  0xcb   : > { %v2792_v40 = vor.u32 %v3226_v31, %v2789_v32  ;;  %v3292_v31 = vld [vmem:[%s3698_s8 + $0x56c] sm:$0xf] }
  0xcc   : > { %v3061_v32 = vld [vmem:[%s3698_s8 + $0x5e8] sm:$0xf0] }
  0xcd   : > { %1882 = vmatpush.bf16.msra.mxu0 %v2508_v41  ;;  %1895 = vmatpush.bf16.msra.mxu1 %v2512_v42  ;;  %v2659_v41 = vld [vmem:[%s3698_s8 + $0x258] sm:$0xf] }
  0xce   : > { %1908 = vmatpush.bf16.msra.mxu2 %v2516_v43  ;;  %1921 = vmatpush.bf16.msra.mxu3 %v2520_v47  ;;  %v3210_v42 = vld [vmem:[%s3698_s8 + $0x2d4] sm:$0xf0]  ;;  %v3194_v43 = vld [vmem:[%s3698_s8 + $0x25c] sm:$0xf]  ;;  %v452_v47 = vld [vmem:[%s3698_s8 + $0x668] sm:$0x33] }
  0xcf   : > { %v2660_v52 = vor.u32 %v3210_v42, %v2659_v41  ;;  %v2664_v56 = vor.u32 %v3194_v43, %v2661_v45  ;;  %v1146_v8 = vunpack.c.h.b16 %v452_v47  ;;  %v3259_v41 = vld [vmem:[%s3698_s8 + $0x464] sm:$0xf] }
  0xd1   : > { %1883 = vmatpush.bf16.msra.mxu0 %v2380_v58  ;;  %1896 = vmatpush.bf16.msra.mxu1 %v2384_v59  ;;  %v3162_v58 = vld [vmem:[%s3698_s8 + $0x15c] sm:$0xf]  ;;  %v1370_v20 = vpack.c.b16 %v1146_v8, %v1146_v8 }
  0xd2   : > { %1909 = vmatpush.bf16.msra.mxu2 %v2388_v60  ;;  %1922 = vmatpush.bf16.msra.mxu3 %v2392_v61  ;;  %v2533_v59 = vld [vmem:[%s3698_s8 + $0x1d8] sm:$0xf0]  ;;  %v1143_v60 = vunpack.c.l.b16 %v451_v46  ;;  %v1144_v61 = vunpack.c.h.b16 %v451_v46  ;;  %v3064_v46 = vor.u32 %v3292_v31, %v3061_v32 }
  0xd3   : > { %v2536_v4 = vor.u32 %v3162_v58, %v2533_v59 }
  0xd4   : > { %3097 = vmatmul.msk.bf16.vlgmr.msra.gmra.mxu0 %vm1567_vm1, %v3772_v44  ;;  %3098 = vmatmul.msk.bf16.vlgmr.msra.gmra.mxu1 %vm1567_vm1, %v3772_v44  ;;  %v1367_v12 = vpack.c.b16 %v1143_v60, %v1143_v60  ;;  %v1368_v13 = vpack.c.b16 %v1144_v61, %v1144_v61  ;;  %v3227_v61 = vld [vmem:[%s3698_s8 + $0x364] sm:$0xf] }
  0xd5   : > { %1929 = vmatpush.bf16.msrb.mxu0 %v1633_v62  ;;  %1942 = vmatpush.bf16.msrb.mxu1 %v1636_v63  ;;  %v1145_v62 = vunpack.c.l.b16 %v452_v47  ;;  %v2524_v63 = vor.u32 %v3177_v49, %v2523_v48  ;;  %v2925_v47 = vld [vmem:[%s3698_s8 + $0x4e0] sm:$0xf0]  ;;  %v2931_v48 = vld [vmem:[%s3698_s8 + $0x468] sm:$0xf] }
  0xd6   : > { %1955 = vmatpush.bf16.msrb.mxu2 %v1639_v0  ;;  %1968 = vmatpush.bf16.msrb.mxu3 %v1642_v1  ;;  %v2395_v0 = vld [vmem:[%s3698_s8 + $0x50] sm:$0xf]  ;;  %v1645_v21 = vsel %vm1571_vm0, %v1367_v12, 0  ;;  %v3276_v49 = vld [vmem:[%s3698_s8 + $0x4e4] sm:$0xf0]  ;;  %v2928_v60 = vor.u32 %v3259_v41, %v2925_v47 }
  0xd7   : > { %3099 = vmatmul.msk.bf16.vlgmr.msra.gmra.mxu2 %vm1567_vm1, %v3772_v44  ;;  %3100 = vmatmul.msk.bf16.vlgmr.msra.gmra.mxu3 %vm1567_vm1, %v3772_v44  ;;  %v3242_v44 = vld [vmem:[%s3698_s8 + $0x3d4] sm:$0xf0]  ;;  %v3145_v1 = vld [vmem:[%s3698_s8 + $0xcc] sm:$0xf0]  ;;  %v2667_v12 = vld [vmem:[%s3698_s8 + $0x260] sm:$0xf] }
  0xd8   : > { %v2788_v39 = vor.u32 %v3242_v44, %v2787_v30  ;;  %v2396_v16 = vor.u32 %v3145_v1, %v2395_v0  ;;  %v3308_v30 = vld [vmem:[%s3698_s8 + $0x5e4] sm:$0xf0]  ;;  %v1654_v44 = vsel %vm1571_vm0, %v1370_v20, 0  ;;  %v2549_v41 = vld [vmem:[%s3698_s8 + $0x1e8] sm:$0xf0] }
  0xd9   : > { %1930 = vmatpush.bf16.msrb.mxu0 %v3036_v10  ;;  %1943 = vmatpush.bf16.msrb.mxu1 %v3040_v11  ;;  %v3130_v10 = vld [vmem:[%s3698_s8 + $0x5c] sm:$0xf]  ;;  %v3060_v45 = vor.u32 %v3308_v30, %v3059_v29  ;;  %v2539_v29 = vld [vmem:[%s3698_s8 + $0x160] sm:$0xf] }
  0xda   : > { %1956 = vmatpush.bf16.msrb.mxu2 %v3044_v14  ;;  %1969 = vmatpush.bf16.msrb.mxu3 %v3048_v15  ;;  %v2405_v11 = vld [vmem:[%s3698_s8 + $0xd8] sm:$0xf0]  ;;  %v1369_v14 = vpack.c.b16 %v1145_v62, %v1145_v62  ;;  %v4078_v15 = vld [vmem:[%s4075_s24] sm:$0xff] }
  0xdb   : > { %v2408_v19 = vor.u32 %v3130_v10, %v2405_v11  ;;  %v464_v24 = vperm.slane %v4078_v15, 1  ;;  %v463_v33 = vperm.slane %v4078_v15, 0  ;;  %v465_v42 = vperm.slane %v4078_v15, 2  ;;  %v2797_v62 = vld [vmem:[%s3698_s8 + $0x3e0] sm:$0xf0] }
  0xdc   : > { %v466_v43 = vperm.slane %v4078_v15, 3  ;;  %v3179_v30 = vld [vmem:[%s3698_s8 + $0x1dc] sm:$0xf0] }
  0xdd   : > { %1931 = vmatpush.bf16.msrb.mxu0 %v2908_v22  ;;  %1944 = vmatpush.bf16.msrb.mxu1 %v2912_v23  ;;  %v1648_v22 = vsel %vm1571_vm0, %v1368_v13, 0  ;;  %v1651_v23 = vsel %vm1571_vm0, %v1369_v14, 0  ;;  %v2800_v14 = vor.u32 %v3227_v61, %v2797_v62  ;;  %v2411_v47 = vld [vmem:[%s3698_s8 + $0x60] sm:$0xf] }
  0xde   : > { %1957 = vmatpush.bf16.msrb.mxu2 %v2916_v26  ;;  %1970 = vmatpush.bf16.msrb.mxu3 %v2920_v27  ;;  %v3307_v26 = vld [vmem:[%s3698_s8 + $0x5dc] sm:$0xf0]  ;;  %v3291_v27 = vld [vmem:[%s3698_s8 + $0x564] sm:$0xf] }
  0xdf   : > { %v3052_v38 = vor.u32 %v3307_v26, %v3051_v25  ;;  %v2677_v26 = vld [vmem:[%s3698_s8 + $0x2e8] sm:$0xf0] }
  0xe1   : > { %1932 = vmatpush.bf16.msrb.mxu0 %v2780_v34  ;;  %1945 = vmatpush.bf16.msrb.mxu1 %v2784_v35  ;;  %v1677_v34 = vpop.f32.mrf.mxu0  ;;  %v1690_v35 = vpop.f32.mrf.mxu1 }
  0xe2   : > { %1958 = vmatpush.bf16.msrb.mxu2 %v2788_v39  ;;  %1971 = vmatpush.bf16.msrb.mxu3 %v2792_v40  ;;  %v1691_v37 = vadd.f32 %v1690_v35, %v464_v24  ;;  %v3056_v39 = vor.u32 %v3291_v27, %v3053_v28  ;;  %v3275_v40 = vld [vmem:[%s3698_s8 + $0x4dc] sm:$0xf0]  ;;  %v1678_v53 = vadd.f32 %v1677_v34, %v463_v33  ;;  %v3196_v24 = vld [vmem:[%s3698_s8 + $0x26c] sm:$0xf]  ;;  %v453_v27 = vld [vmem:[%s3698_s8 + $0x670] sm:$0x33] }
  0xe3   : > { %v2924_v55 = vor.u32 %v3275_v40, %v2923_v36  ;;  %v454_v28 = vld [vmem:[%s3698_s8 + $0x678] sm:$0x33]  ;;  %v3163_v35 = vld [vmem:[%s3698_s8 + $0x164] sm:$0xf]  ;;  %v3164_v40 = vld [vmem:[%s3698_s8 + $0x16c] sm:$0xf] }
  0xe4   : > { %v2116_v54 = vrot.slane %v1691_v37, 6  ;;  %v2541_v36 = vld [vmem:[%s3698_s8 + $0x1e0] sm:$0xf0]  ;;  %v2547_v37 = vld [vmem:[%s3698_s8 + $0x168] sm:$0xf] }
  0xe5   : > { %1933 = vmatpush.bf16.msrb.mxu0 %v2652_v50  ;;  %1946 = vmatpush.bf16.msrb.mxu1 %v2656_v51  ;;  %v3260_v50 = vld [vmem:[%s3698_s8 + $0x46c] sm:$0xf] }
  0xe6   : > { %1959 = vmatpush.bf16.msrb.mxu2 %v2660_v52  ;;  %1972 = vmatpush.bf16.msrb.mxu3 %v2664_v56  ;;  %v2933_v51 = vld [vmem:[%s3698_s8 + $0x4e8] sm:$0xf0]  ;;  %v4104_v52 = vld [vmem:[#allocation2] sm:$0x1]  ;;  %v2795_v56 = vld [vmem:[%s3698_s8 + $0x360] sm:$0xf]  ;;  %v2140_v7 = vsel %vm1571_vm0, %v1678_v53, %v2116_v54 }
  0xe7   : > { %v2796_v13 = vor.u32 %v3243_v57, %v2795_v56  ;;  %v3131_v53 = vld [vmem:[%s3698_s8 + $0x64] sm:$0xf]  ;;  %v1150_v56 = vunpack.c.h.b16 %v454_v28  ;;  %v3148_v57 = vld [vmem:[%s3698_s8 + $0xe4] sm:$0xf0] }
  0xe8   : > { %v2413_v54 = vld [vmem:[%s3698_s8 + $0xe0] sm:$0xf0] }
  0xe9   : > { %1934 = vmatpush.bf16.msrb.mxu0 %v2524_v63  ;;  %1947 = vmatpush.bf16.msrb.mxu1 %v2528_v2  ;;  %v2803_v63 = vld [vmem:[%s3698_s8 + $0x368] sm:$0xf]  ;;  %v2932_v2 = vor.u32 %v3276_v49, %v2931_v48  ;;  %v1679_v10 = vpop.f32.mrf.mxu0  ;;  %v1692_v11 = vpop.f32.mrf.mxu1  ;;  %v3147_v48 = vld [vmem:[%s3698_s8 + $0xdc] sm:$0xf0]  ;;  %v2544_v49 = vor.u32 %v3163_v35, %v2541_v36 }
  0xea   : > { %1960 = vmatpush.bf16.msrb.mxu2 %v2532_v3  ;;  %1973 = vmatpush.bf16.msrb.mxu3 %v2536_v4  ;;  %v1703_v58 = vpop.f32.mrf.mxu2  ;;  %v1716_v59 = vpop.f32.mrf.mxu3  ;;  %v2936_v3 = vor.u32 %v3260_v50, %v2933_v51  ;;  %v3244_v4 = vld [vmem:[%s3698_s8 + $0x3e4] sm:$0xf0]  ;;  %v2552_v51 = vor.u32 %v3164_v40, %v2549_v41  ;;  %v3293_v10 = vld [vmem:[%s3698_s8 + $0x574] sm:$0xf]  ;;  %v2811_v40 = vld [vmem:[%s3698_s8 + $0x370] sm:$0xf] }
  0xeb   : > { %v1704_v0 = vadd.f32 %v1703_v58, %v465_v42  ;;  %v1717_v1 = vadd.f32 %v1716_v59, %v466_v43  ;;  %v2804_v20 = vor.u32 %v3244_v4, %v2803_v63  ;;  %v1147_v42 = vunpack.c.l.b16 %v453_v27  ;;  %v3132_v58 = vld [vmem:[%s3698_s8 + $0x6c] sm:$0xf]  ;;  %v3069_v11 = vld [vmem:[%s3698_s8 + $0x5f0] sm:$0xf0]  ;;  %v3245_v41 = vld [vmem:[%s3698_s8 + $0x3ec] sm:$0xf0] }
  0xec   : > { %v1148_v43 = vunpack.c.h.b16 %v453_v27  ;;  %v2421_v59 = vld [vmem:[%s3698_s8 + $0xe8] sm:$0xf0]  ;;  %v2412_v63 = vor.u32 %v3147_v48, %v2411_v47  ;;  %v469_v27 = vperm.slane %v4078_v15, 6  ;;  %v2813_v48 = vld [vmem:[%s3698_s8 + $0x3f0] sm:$0xf0] }
  0xed   : > { %1935 = vmatpush.bf16.msrb.mxu0 %v2396_v16  ;;  %1948 = vmatpush.bf16.msrb.mxu1 %v2400_v17  ;;  %v2117_v8 = vrot.slane %v1704_v0, 4  ;;  %v2118_v9 = vrot.slane %v1717_v1, 2  ;;  %v3211_v16 = vld [vmem:[%s3698_s8 + $0x2dc] sm:$0xf0]  ;;  %v3195_v17 = vld [vmem:[%s3698_s8 + $0x264] sm:$0xf]  ;;  %v2416_v0 = vor.u32 %v3131_v53, %v2413_v54 }
  0xee   : > { %1961 = vmatpush.bf16.msrb.mxu2 %v2404_v18  ;;  %1974 = vmatpush.bf16.msrb.mxu3 %v2408_v19  ;;  %v2669_v18 = vld [vmem:[%s3698_s8 + $0x2e0] sm:$0xf0]  ;;  %v2668_v32 = vor.u32 %v3211_v16, %v2667_v12  ;;  %v1372_v61 = vpack.c.b16 %v1148_v43, %v1148_v43  ;;  %v3075_v12 = vld [vmem:[%s3698_s8 + $0x578] sm:$0xf]  ;;  %v3294_v16 = vld [vmem:[%s3698_s8 + $0x57c] sm:$0xf] }
  0xef   : > { %v2142_v19 = vsel %vm2141_vm2, %v2117_v8, %v2118_v9  ;;  %v2672_v33 = vor.u32 %v3195_v17, %v2669_v18  ;;  %v3067_v8 = vld [vmem:[%s3698_s8 + $0x570] sm:$0xf]  ;;  %v3077_v17 = vld [vmem:[%s3698_s8 + $0x5f8] sm:$0xf0]  ;;  %v467_v18 = vperm.slane %v4078_v15, 4 }
  0xf0   : > { %3101 = vmatmul.msk.bf16.vlgmr.msrb.gmra.mxu0 %vm1567_vm1, %v4104_v52  ;;  %3102 = vmatmul.msk.bf16.vlgmr.msrb.gmra.mxu1 %vm1567_vm1, %v4104_v52  ;;  %v2144_v25 = vsel %vm2143_vm3, %v2140_v7, %v2142_v19  ;;  %v468_v7 = vperm.slane %v4078_v15, 5  ;;  %v3309_v9 = vld [vmem:[%s3698_s8 + $0x5ec] sm:$0xf0]  ;;  %v2821_v53 = vld [vmem:[%s3698_s8 + $0x3f8] sm:$0xf0] }
  0xf1   : > { %1981 = vmatpush.bf16.msra.mxu0 %v1645_v21  ;;  %1994 = vmatpush.bf16.msra.mxu1 %v1648_v22  ;;  %v2808_v21 = vor.u32 %v3228_v5, %v2805_v6  ;;  %v2675_v22 = vld [vmem:[%s3698_s8 + $0x268] sm:$0xf]  ;;  %2174 = vst [vmem:[%s4136_s11] sm:$0xff] %v2144_v25  ;;  %v1660_v5 = vsel %vm1571_vm0, %v1372_v61, 0  ;;  %v3277_v25 = vld [vmem:[%s3698_s8 + $0x4ec] sm:$0xf0] }
  0xf2   : > { %2007 = vmatpush.bf16.msra.mxu2 %v1651_v23  ;;  %2020 = vmatpush.bf16.msra.mxu3 %v1654_v44  ;;  %v3212_v23 = vld [vmem:[%s3698_s8 + $0x2e4] sm:$0xf0]  ;;  %v1705_v44 = vpop.f32.mrf.mxu2  ;;  %v1718_v31 = vpop.f32.mrf.mxu3  ;;  %v2683_v61 = vld [vmem:[%s3698_s8 + $0x270] sm:$0xf] }
  0xf3   : > { %3103 = vmatmul.msk.bf16.vlgmr.msrb.gmra.mxu2 %vm1567_vm1, %v4104_v52  ;;  %3104 = vmatmul.msk.bf16.vlgmr.msrb.gmra.mxu3 %vm1567_vm1, %v4104_v52  ;;  %v2676_v34 = vor.u32 %v3212_v23, %v2675_v22  ;;  %v3068_v23 = vor.u32 %v3309_v9, %v3067_v8  ;;  %v2941_v44 = vld [vmem:[%s3698_s8 + $0x4f0] sm:$0xf0]  ;;  %v2947_v31 = vld [vmem:[%s3698_s8 + $0x478] sm:$0xf]  ;;  %v2693_v8 = vld [vmem:[%s3698_s8 + $0x2f8] sm:$0xf0] }
  0xf5   : > { %1982 = vmatpush.bf16.msra.mxu0 %v3052_v38  ;;  %1995 = vmatpush.bf16.msra.mxu1 %v3056_v39  ;;  %v2680_v38 = vor.u32 %v3196_v24, %v2677_v26  ;;  %v3180_v39 = vld [vmem:[%s3698_s8 + $0x1e4] sm:$0xf0]  ;;  %v3072_v24 = vor.u32 %v3293_v10, %v3069_v11  ;;  %v3261_v26 = vld [vmem:[%s3698_s8 + $0x474] sm:$0xf] }
  0xf6   : > { %2008 = vmatpush.bf16.msra.mxu2 %v3060_v45  ;;  %2021 = vmatpush.bf16.msra.mxu3 %v3064_v46  ;;  %v1149_v45 = vunpack.c.l.b16 %v454_v28  ;;  %v2540_v46 = vor.u32 %v3179_v30, %v2539_v29  ;;  %v2548_v50 = vor.u32 %v3180_v39, %v2547_v37  ;;  %v470_v28 = vperm.slane %v4078_v15, 7 }
  0xf7   : > { %v3080_v30 = vor.u32 %v3294_v16, %v3077_v17  ;;  %v2944_v39 = vor.u32 %v3261_v26, %v2941_v44  ;;  %v2427_v26 = vld [vmem:[%s3698_s8 + $0x70] sm:$0xf]  ;;  %v2429_v44 = vld [vmem:[%s3698_s8 + $0xf0] sm:$0xf0] }
  0xf8   : > { %v1373_v62 = vpack.c.b16 %v1149_v45, %v1149_v45 }
  0xf9   : > { %1983 = vmatpush.bf16.msra.mxu0 %v2924_v55  ;;  %1996 = vmatpush.bf16.msra.mxu1 %v2928_v60  ;;  %v2419_v55 = vld [vmem:[%s3698_s8 + $0x68] sm:$0xf]  ;;  %v1371_v60 = vpack.c.b16 %v1147_v42, %v1147_v42  ;;  %v3229_v42 = vld [vmem:[%s3698_s8 + $0x374] sm:$0xf] }
  0xfa   : > { %2009 = vmatpush.bf16.msra.mxu2 %v2932_v2  ;;  %2022 = vmatpush.bf16.msra.mxu3 %v2936_v3  ;;  %v2420_v1 = vor.u32 %v3148_v57, %v2419_v55  ;;  %v2424_v2 = vor.u32 %v3132_v58, %v2421_v59  ;;  %v1374_v3 = vpack.c.b16 %v1150_v56, %v1150_v56  ;;  %v1663_v6 = vsel %vm1571_vm0, %v1373_v62, 0  ;;  %v3213_v62 = vld [vmem:[%s3698_s8 + $0x2ec] sm:$0xf0] }
  0xfb   : > { %v1657_v4 = vsel %vm1571_vm0, %v1371_v60, 0  ;;  %v2812_v59 = vor.u32 %v3245_v41, %v2811_v40  ;;  %v2816_v60 = vor.u32 %v3229_v42, %v2813_v48  ;;  %v2684_v11 = vor.u32 %v3213_v62, %v2683_v61 }
  0xfd   : > { %1984 = vmatpush.bf16.msra.mxu0 %v2796_v13  ;;  %1997 = vmatpush.bf16.msra.mxu1 %v2800_v14  ;;  %v3310_v13 = vld [vmem:[%s3698_s8 + $0x5f4] sm:$0xf0]  ;;  %v1666_v14 = vsel %vm1571_vm0, %v1374_v3, 0  ;;  %v1729_v19 = vpop.f32.mrf.mxu0  ;;  %v2685_v3 = vld [vmem:[%s3698_s8 + $0x2f0] sm:$0xf0] }
  0xfe   : > { %2010 = vmatpush.bf16.msra.mxu2 %v2804_v20  ;;  %2023 = vmatpush.bf16.msra.mxu3 %v2808_v21  ;;  %v1742_v20 = vpop.f32.mrf.mxu1  ;;  %v2939_v21 = vld [vmem:[%s3698_s8 + $0x470] sm:$0xf]  ;;  %v3076_v29 = vor.u32 %v3310_v13, %v3075_v12  ;;  %v1730_v35 = vadd.f32 %v1729_v19, %v467_v18  ;;  %v3165_v18 = vld [vmem:[%s3698_s8 + $0x174] sm:$0xf] }
  0xff   : > { %v1743_v22 = vadd.f32 %v1742_v20, %v468_v7  ;;  %v2940_v36 = vor.u32 %v3277_v25, %v2939_v21  ;;  %v3198_v7 = vld [vmem:[%s3698_s8 + $0x27c] sm:$0xf]  ;;  %v2555_v13 = vld [vmem:[%s3698_s8 + $0x170] sm:$0xf]  ;;  %v2557_v19 = vld [vmem:[%s3698_s8 + $0x1f0] sm:$0xf0] }
 0x100   : > { %v2696_v17 = vor.u32 %v3198_v7, %v2693_v8  ;;  %v2563_v20 = vld [vmem:[%s3698_s8 + $0x178] sm:$0xf]  ;;  %v2560_v25 = vor.u32 %v3165_v18, %v2557_v19 }
 0x101   : > { %1985 = vmatpush.bf16.msra.mxu0 %v2668_v32  ;;  %1998 = vmatpush.bf16.msra.mxu1 %v2672_v33  ;;  %v3278_v32 = vld [vmem:[%s3698_s8 + $0x4f4] sm:$0xf0]  ;;  %v3262_v33 = vld [vmem:[%s3698_s8 + $0x47c] sm:$0xf]  ;;  %v2119_v15 = vrot.slane %v1743_v22, 6 }
 0x102   : > { %2011 = vmatpush.bf16.msra.mxu2 %v2676_v34  ;;  %2024 = vmatpush.bf16.msra.mxu3 %v2680_v38  ;;  %v2949_v34 = vld [vmem:[%s3698_s8 + $0x4f8] sm:$0xf0]  ;;  %v3182_v21 = vld [vmem:[%s3698_s8 + $0x1f4] sm:$0xf0] }
 0x103   : > { %v2952_v47 = vor.u32 %v3262_v33, %v2949_v34  ;;  %v2145_v54 = vsel %vm1571_vm0, %v1730_v35, %v2119_v15  ;;  %v3166_v22 = vld [vmem:[%s3698_s8 + $0x17c] sm:$0xf]  ;;  %v456_v35 = vld [vmem:[%s4075_s24 + $0x8] sm:$0xff] }
 0x104   : > { %v3134_v33 = vld [vmem:[%s3698_s8 + $0x7c] sm:$0xf]  ;;  %v471_v40 = vperm.slane %v456_v35, 0 }
 0x105   : > { %1986 = vmatpush.bf16.msra.mxu0 %v2540_v46  ;;  %1999 = vmatpush.bf16.msra.mxu1 %v2544_v49  ;;  %v2948_v46 = vor.u32 %v3278_v32, %v2947_v31  ;;  %v2819_v49 = vld [vmem:[%s3698_s8 + $0x378] sm:$0xf]  ;;  %v1731_v57 = vpop.f32.mrf.mxu0  ;;  %v2437_v34 = vld [vmem:[%s3698_s8 + $0xf8] sm:$0xf0] }
 0x106   : > { %2012 = vmatpush.bf16.msra.mxu2 %v2548_v50  ;;  %2025 = vmatpush.bf16.msra.mxu3 %v2552_v51  ;;  %v1755_v37 = vpop.f32.mrf.mxu2  ;;  %v1768_v38 = vpop.f32.mrf.mxu3  ;;  %v3246_v50 = vld [vmem:[%s3698_s8 + $0x3f4] sm:$0xf0]  ;;  %v3230_v51 = vld [vmem:[%s3698_s8 + $0x37c] sm:$0xf] }
 0x107   : > { %v1756_v43 = vadd.f32 %v1755_v37, %v469_v27  ;;  %v1769_v45 = vadd.f32 %v1768_v38, %v470_v28  ;;  %v1744_v58 = vpop.f32.mrf.mxu1  ;;  %v3149_v27 = vld [vmem:[%s3698_s8 + $0xec] sm:$0xf0]  ;;  %v3133_v28 = vld [vmem:[%s3698_s8 + $0x74] sm:$0xf]  ;;  %v2435_v31 = vld [vmem:[%s3698_s8 + $0x78] sm:$0xf]  ;;  %v2440_v38 = vor.u32 %v3134_v33, %v2437_v34 }
 0x108   : > { %v3150_v32 = vld [vmem:[%s3698_s8 + $0xf4] sm:$0xf0]  ;;  %v2428_v15 = vor.u32 %v3149_v27, %v2427_v26 }
 0x109   : > { %1987 = vmatpush.bf16.msra.mxu0 %v2412_v63  ;;  %2000 = vmatpush.bf16.msra.mxu1 %v2416_v0  ;;  %v2120_v55 = vrot.slane %v1756_v43, 4  ;;  %v2121_v56 = vrot.slane %v1769_v45, 2  ;;  %v3197_v63 = vld [vmem:[%s3698_s8 + $0x274] sm:$0xf]  ;;  %v2436_v37 = vor.u32 %v3150_v32, %v2435_v31  ;;  %v473_v45 = vperm.slane %v456_v35, 2 }
 0x10a   : > { %2013 = vmatpush.bf16.msra.mxu2 %v2420_v1  ;;  %2026 = vmatpush.bf16.msra.mxu3 %v2424_v2  ;;  %v2820_v1 = vor.u32 %v3246_v50, %v2819_v49  ;;  %v2824_v2 = vor.u32 %v3230_v51, %v2821_v53  ;;  %v2688_v12 = vor.u32 %v3197_v63, %v2685_v3  ;;  %v475_v63 = vperm.slane %v456_v35, 4 }
 0x10b   : > { %v2146_v0 = vsel %vm2141_vm2, %v2120_v55, %v2121_v56  ;;  %v477_v3 = vperm.slane %v456_v35, 6 }
 0x10c   : > { %3105 = vmatmul.msk.bf16.vlgmr.msra.gmra.mxu0 %vm1567_vm1, %v4104_v52  ;;  %3106 = vmatmul.msk.bf16.vlgmr.msra.gmra.mxu1 %vm1567_vm1, %v4104_v52 }
 0x10d   : > { %2033 = vmatpush.bf16.msrb.mxu0 %v1657_v4  ;;  %2046 = vmatpush.bf16.msrb.mxu1 %v1660_v5  ;;  %v2691_v4 = vld [vmem:[%s3698_s8 + $0x278] sm:$0xf] }
 0x10e   : > { %2059 = vmatpush.bf16.msrb.mxu2 %v1663_v6  ;;  %2072 = vmatpush.bf16.msrb.mxu3 %v1666_v14  ;;  %v3214_v5 = vld [vmem:[%s3698_s8 + $0x2f4] sm:$0xf0]  ;;  %v2147_v6 = vsel %vm2143_vm3, %v2145_v54, %v2146_v0  ;;  %v1757_v9 = vpop.f32.mrf.mxu2  ;;  %v1770_v10 = vpop.f32.mrf.mxu3  ;;  %v3181_v14 = vld [vmem:[%s3698_s8 + $0x1ec] sm:$0xf0] }
 0x10f   : > { %3107 = vmatmul.msk.bf16.vlgmr.msra.gmra.mxu2 %vm1567_vm1, %v4104_v52  ;;  %3108 = vmatmul.msk.bf16.vlgmr.msra.gmra.mxu3 %vm1567_vm1, %v4104_v52  ;;  %2175 = vst [vmem:[%s4136_s11 + $0x8] sm:$0xff] %v2147_v6  ;;  %v2692_v16 = vor.u32 %v3214_v5, %v2691_v4  ;;  %v478_v4 = vperm.slane %v456_v35, 7 }
 0x111   : > { %2034 = vmatpush.bf16.msrb.mxu0 %v3068_v23  ;;  %2047 = vmatpush.bf16.msrb.mxu1 %v3072_v24  ;;  %v2565_v23 = vld [vmem:[%s3698_s8 + $0x1f8] sm:$0xf0]  ;;  %v2556_v24 = vor.u32 %v3181_v14, %v2555_v13 }
 0x112   : > { %2060 = vmatpush.bf16.msrb.mxu2 %v3076_v29  ;;  %2073 = vmatpush.bf16.msrb.mxu3 %v3080_v30  ;;  %v2564_v29 = vor.u32 %v3182_v21, %v2563_v20  ;;  %v2568_v30 = vor.u32 %v3166_v22, %v2565_v23  ;;  %v457_v21 = vld [vmem:[%s4075_s24 + $0x10] sm:$0xff] }
 0x113   : > { %v480_v22 = vperm.slane %v457_v21, 1  ;;  %v479_v23 = vperm.slane %v457_v21, 0  ;;  %v481_v27 = vperm.slane %v457_v21, 2 }
 0x115   : > { %2035 = vmatpush.bf16.msrb.mxu0 %v2940_v36  ;;  %2048 = vmatpush.bf16.msrb.mxu1 %v2944_v39  ;;  %v2432_v36 = vor.u32 %v3133_v28, %v2429_v44  ;;  %v472_v39 = vperm.slane %v456_v35, 1  ;;  %v482_v28 = vperm.slane %v457_v21, 3 }
 0x116   : > { %2061 = vmatpush.bf16.msrb.mxu2 %v2948_v46  ;;  %2074 = vmatpush.bf16.msrb.mxu3 %v2952_v47  ;;  %v474_v46 = vperm.slane %v456_v35, 3 }
 0x119   : > { %2036 = vmatpush.bf16.msrb.mxu0 %v2812_v59  ;;  %2049 = vmatpush.bf16.msrb.mxu1 %v2816_v60  ;;  %v1781_v41 = vpop.f32.mrf.mxu0  ;;  %v1794_v42 = vpop.f32.mrf.mxu1 }
 0x11a   : > { %2062 = vmatpush.bf16.msrb.mxu2 %v2820_v1  ;;  %2075 = vmatpush.bf16.msrb.mxu3 %v2824_v2  ;;  %v1795_v43 = vadd.f32 %v1794_v42, %v472_v39  ;;  %v1782_v47 = vadd.f32 %v1781_v41, %v471_v40  ;;  %v484_v42 = vperm.slane %v457_v21, 5 }
 0x11c   : > { %v2122_v48 = vrot.slane %v1795_v43, 6  ;;  %v483_v43 = vperm.slane %v457_v21, 4 }
 0x11d   : > { %2037 = vmatpush.bf16.msrb.mxu0 %v2684_v11  ;;  %2050 = vmatpush.bf16.msrb.mxu1 %v2688_v12 }
 0x11e   : > { %2063 = vmatpush.bf16.msrb.mxu2 %v2692_v16  ;;  %2076 = vmatpush.bf16.msrb.mxu3 %v2696_v17  ;;  %v2148_v54 = vsel %vm1571_vm0, %v1782_v47, %v2122_v48  ;;  %v485_v48 = vperm.slane %v457_v21, 6 }
 0x121   : > { %2038 = vmatpush.bf16.msrb.mxu0 %v2556_v24  ;;  %2051 = vmatpush.bf16.msrb.mxu1 %v2560_v25  ;;  %v1783_v57 = vpop.f32.mrf.mxu0  ;;  %v1796_v58 = vpop.f32.mrf.mxu1 }
 0x122   : > { %2064 = vmatpush.bf16.msrb.mxu2 %v2564_v29  ;;  %2077 = vmatpush.bf16.msrb.mxu3 %v2568_v30  ;;  %v1807_v49 = vpop.f32.mrf.mxu2  ;;  %v1820_v50 = vpop.f32.mrf.mxu3 }
 0x123   : > { %v1808_v51 = vadd.f32 %v1807_v49, %v473_v45  ;;  %v1821_v53 = vadd.f32 %v1820_v50, %v474_v46  ;;  %v486_v49 = vperm.slane %v457_v21, 7 }
 0x125   : > { %2039 = vmatpush.bf16.msrb.mxu0 %v2428_v15  ;;  %2052 = vmatpush.bf16.msrb.mxu1 %v2432_v36  ;;  %v2123_v55 = vrot.slane %v1808_v51, 4  ;;  %v2124_v56 = vrot.slane %v1821_v53, 2 }
 0x126   : > { %2065 = vmatpush.bf16.msrb.mxu2 %v2436_v37  ;;  %2078 = vmatpush.bf16.msrb.mxu3 %v2440_v38 }
 0x127   : > { %v2149_v59 = vsel %vm2141_vm2, %v2123_v55, %v2124_v56 }
 0x128   : > { %3109 = vmatmul.msk.bf16.vlgmr.msrb.gmra.mxu0 %vm1567_vm1, %v4104_v52  ;;  %3110 = vmatmul.msk.bf16.vlgmr.msrb.gmra.mxu1 %vm1567_vm1, %v4104_v52  ;;  %v2150_v60 = vsel %vm2143_vm3, %v2148_v54, %v2149_v59 }
 0x129   : > { %3111 = vmatmul.msk.bf16.vlgmr.msrb.gmra.mxu2 %vm1567_vm1, %v4104_v52  ;;  %3112 = vmatmul.msk.bf16.vlgmr.msrb.gmra.mxu3 %vm1567_vm1, %v4104_v52  ;;  %2176 = vst [vmem:[%s4136_s11 + $0x10] sm:$0xff] %v2150_v60  ;;  %v476_v52 = vperm.slane %v456_v35, 5 }
 0x12a   : > { %v1809_v61 = vpop.f32.mrf.mxu2  ;;  %v1822_v62 = vpop.f32.mrf.mxu3 }
 0x135   : > { %v1833_v0 = vpop.f32.mrf.mxu0  ;;  %v1846_v1 = vpop.f32.mrf.mxu1 }
 0x136   : > { %v1847_v2 = vadd.f32 %v1846_v1, %v476_v52  ;;  %v1834_v5 = vadd.f32 %v1833_v0, %v475_v63  ;;  %v458_v1 = vld [vmem:[%s4075_s24 + $0x18] sm:$0xff] }
 0x138   : > { %v2125_v6 = vrot.slane %v1847_v2, 6  ;;  %v488_v2 = vperm.slane %v458_v1, 1 }
 0x13a   : > { %v2151_v11 = vsel %vm1571_vm0, %v1834_v5, %v2125_v6 }
 0x13d   : > { %v1835_v14 = vpop.f32.mrf.mxu0  ;;  %v1848_v16 = vpop.f32.mrf.mxu1 }
 0x13e   : > { %v1859_v7 = vpop.f32.mrf.mxu2  ;;  %v1872_v8 = vpop.f32.mrf.mxu3 }
 0x13f   : > { %v1860_v9 = vadd.f32 %v1859_v7, %v477_v3  ;;  %v1873_v10 = vadd.f32 %v1872_v8, %v478_v4  ;;  %v487_v3 = vperm.slane %v458_v1, 0  ;;  %v489_v7 = vperm.slane %v458_v1, 2 }
 0x140   : > { %v490_v8 = vperm.slane %v458_v1, 3 }
 0x141   : > { %v2126_v12 = vrot.slane %v1860_v9, 4  ;;  %v2127_v13 = vrot.slane %v1873_v10, 2 }
 0x143   : > { %v2152_v17 = vsel %vm2141_vm2, %v2126_v12, %v2127_v13 }
 0x144   : > { %v2153_v18 = vsel %vm2143_vm3, %v2151_v11, %v2152_v17 }
 0x145   : > { %2177 = vst [vmem:[%s4136_s11 + $0x18] sm:$0xff] %v2153_v18 }
 0x146   : > { %v1861_v19 = vpop.f32.mrf.mxu2  ;;  %v1874_v20 = vpop.f32.mrf.mxu3 }
 0x151   : > { %v1885_v24 = vpop.f32.mrf.mxu0  ;;  %v1898_v25 = vpop.f32.mrf.mxu1 }
 0x152   : > { %v1899_v26 = vadd.f32 %v1898_v25, %v480_v22  ;;  %v1886_v29 = vadd.f32 %v1885_v24, %v479_v23 }
 0x154   : > { %v2128_v30 = vrot.slane %v1899_v26, 6  ;;  %v492_v26 = vperm.slane %v458_v1, 5 }
 0x156   : > { %v2154_v34 = vsel %vm1571_vm0, %v1886_v29, %v2128_v30  ;;  %v493_v30 = vperm.slane %v458_v1, 6 }
 0x159   : > { %v1887_v36 = vpop.f32.mrf.mxu0  ;;  %v1900_v37 = vpop.f32.mrf.mxu1 }
 0x15a   : > { %v1911_v44 = vpop.f32.mrf.mxu2  ;;  %v1924_v31 = vpop.f32.mrf.mxu3 }
 0x15b   : > { %v1912_v32 = vadd.f32 %v1911_v44, %v481_v27  ;;  %v1925_v33 = vadd.f32 %v1924_v31, %v482_v28  ;;  %v491_v28 = vperm.slane %v458_v1, 4  ;;  %v494_v44 = vperm.slane %v458_v1, 7 }
 0x15d   : > { %v2129_v35 = vrot.slane %v1912_v32, 4  ;;  %v2130_v15 = vrot.slane %v1925_v33, 2 }
 0x15f   : > { %v2155_v38 = vsel %vm2141_vm2, %v2129_v35, %v2130_v15 }
 0x160   : > { %v2156_v39 = vsel %vm2143_vm3, %v2154_v34, %v2155_v38 }
 0x161   : > { %2178 = vst [vmem:[%s4136_s11 + $0x20] sm:$0xff] %v2156_v39 }
 0x162   : > { %v1913_v40 = vpop.f32.mrf.mxu2  ;;  %v1926_v41 = vpop.f32.mrf.mxu3 }
 0x16d   : > { %v1937_v45 = vpop.f32.mrf.mxu0  ;;  %v1950_v46 = vpop.f32.mrf.mxu1 }
 0x16e   : > { %v1951_v47 = vadd.f32 %v1950_v46, %v484_v42  ;;  %v1938_v50 = vadd.f32 %v1937_v45, %v483_v43 }
 0x170   : > { %v2131_v51 = vrot.slane %v1951_v47, 6 }
 0x172   : > { %v2157_v57 = vsel %vm1571_vm0, %v1938_v50, %v2131_v51 }
 0x175   : > { %v1939_v60 = vpop.f32.mrf.mxu0  ;;  %v1952_v61 = vpop.f32.mrf.mxu1 }
 0x176   : > { %v1963_v53 = vpop.f32.mrf.mxu2  ;;  %v1976_v54 = vpop.f32.mrf.mxu3 }
 0x177   : > { %v1964_v55 = vadd.f32 %v1963_v53, %v485_v48  ;;  %v1977_v56 = vadd.f32 %v1976_v54, %v486_v49 }
 0x179   : > { %v2132_v58 = vrot.slane %v1964_v55, 4  ;;  %v2133_v59 = vrot.slane %v1977_v56, 2 }
 0x17b   : > { %v2158_v62 = vsel %vm2141_vm2, %v2132_v58, %v2133_v59 }
 0x17c   : > { %v2159_v52 = vsel %vm2143_vm3, %v2157_v57, %v2158_v62 }
 0x17d   : > { %2179 = vst [vmem:[%s4136_s11 + $0x28] sm:$0xff] %v2159_v52 }
 0x17e   : > { %v1965_v63 = vpop.f32.mrf.mxu2  ;;  %v1978_v0 = vpop.f32.mrf.mxu3 }
 0x189   : > { %v1989_v4 = vpop.f32.mrf.mxu0  ;;  %v2002_v5 = vpop.f32.mrf.mxu1 }
 0x18a   : > { %v2003_v6 = vadd.f32 %v2002_v5, %v488_v2  ;;  %v1990_v9 = vadd.f32 %v1989_v4, %v487_v3 }
 0x18c   : > { %v2134_v10 = vrot.slane %v2003_v6, 6 }
 0x18e   : > { %v2160_v16 = vsel %vm1571_vm0, %v1990_v9, %v2134_v10 }
 0x191   : > { %v1991_v19 = vpop.f32.mrf.mxu0  ;;  %v2004_v20 = vpop.f32.mrf.mxu1 }
 0x192   : > { %v2015_v11 = vpop.f32.mrf.mxu2  ;;  %v2028_v12 = vpop.f32.mrf.mxu3 }
 0x193   : > { %v2016_v13 = vadd.f32 %v2015_v11, %v489_v7  ;;  %v2029_v14 = vadd.f32 %v2028_v12, %v490_v8 }
 0x195   : > { %v2135_v17 = vrot.slane %v2016_v13, 4  ;;  %v2136_v18 = vrot.slane %v2029_v14, 2 }
 0x197   : > { %v2161_v21 = vsel %vm2141_vm2, %v2135_v17, %v2136_v18 }
 0x198   : > { %v2162_v22 = vsel %vm2143_vm3, %v2160_v16, %v2161_v21 }
 0x199   : > { %2180 = vst [vmem:[%s4136_s11 + $0x30] sm:$0xff] %v2162_v22 }
 0x19a   : > { %v2017_v23 = vpop.f32.mrf.mxu2  ;;  %v2030_v24 = vpop.f32.mrf.mxu3 }
 0x1a5   : > { %v2041_v25 = vpop.f32.mrf.mxu0  ;;  %v2054_v27 = vpop.f32.mrf.mxu1 }
 0x1a6   : > { %v2055_v29 = vadd.f32 %v2054_v27, %v492_v26  ;;  %v2042_v33 = vadd.f32 %v2041_v25, %v491_v28 }
 0x1a8   : > { %v2137_v34 = vrot.slane %v2055_v29, 6 }
 0x1aa   : > { %v2163_v40 = vsel %vm1571_vm0, %v2042_v33, %v2137_v34 }
 0x1ac   : > { %v2067_v31 = vpop.f32.mrf.mxu2  ;;  %v2080_v32 = vpop.f32.mrf.mxu3 }
 0x1ad   : > { %v2068_v35 = vadd.f32 %v2067_v31, %v493_v30  ;;  %v2081_v15 = vadd.f32 %v2080_v32, %v494_v44  ;;  %v2043_v36 = vpop.f32.mrf.mxu0  ;;  %v2056_v37 = vpop.f32.mrf.mxu1 }
 0x1af   : > { %v2138_v38 = vrot.slane %v2068_v35, 4  ;;  %v2139_v39 = vrot.slane %v2081_v15, 2 }
 0x1b1   : > { %v2164_v41 = vsel %vm2141_vm2, %v2138_v38, %v2139_v39 }
 0x1b2   : > { %v2165_v42 = vsel %vm2143_vm3, %v2163_v40, %v2164_v41 }
 0x1b3   : > { %2181 = vst [vmem:[%s4136_s11 + $0x38] sm:$0xff] %v2165_v42 }
 0x1b4   : > { %v2069_v43 = vpop.f32.mrf.mxu2  ;;  %v2082_v45 = vpop.f32.mrf.mxu3 }
 0x1b5   : > { %3497 = shalt.err (!%p3494_p5)
}
 0x1b6   : > { %3322 = dma.vmem_to_hbm [thread:$0]  (%p3649_p11), %s2197_s21, 1024, %s2199_s22, %s2183_s28  }
 0x1b7 PF: > { %s2210_s30 = sand.u32 1, %s3528_s12   ;;  %p4305_p7 = scmp.ge.s32.totalorder %s3540_s15, 2 }
 0x1b8   : > { %s2211_s8 = scalar_lea.sflag [#allocation4], %s2210_s30 }
 0x1b9   : > { %p3336_p9 = pnand %p4305_p7, %p3653_p12 }
 0x1bb   : > { %p3337_p13 = pneg %p3336_p9 }
 0x1bd   : > { %3523 = dma.done.wait (%p3337_p13), %s2211_s8, 1024  }
 0x1be   : > { %3525 = vsyncadd (%p3337_p13), %s2211_s8, 4294966272  ;;  %p17_p0 = scmp.ge.s32.totalorder %s3587_s16, 4   ;;  %s4306_s12 = smov %s3532_s13 }
 0x1bf   : > { %s4307_s13 = smov %s3536_s14  ;;  %s4308_s14 = smov %s3598_s19 }
 0x1c0   : > { %s4309_s15 = smov %s3587_s16  ;;  %19 = sbr.rel (!%p17_p0) target bundleno = 8 (0x8), region = 93 }
 0x1c5   :  { %2217 = vsyncpa [#allocation3], 1 }
 0x1c6   :  { %2219 = vsyncpa [#allocation3 + $0x1], 1 }
 0x1c7   :  { %2220 = vsyncpa [#allocation6], 1 }
 0x1c8   :  { %2222 = vsyncpa [#allocation6 + $0x1], 1 }
 0x1c9   :  { %2223 = vsyncpa [#allocation4], 1 }
 0x1ca   :  { %2225 = vsyncpa [#allocation4 + $0x1], 1 }

</bundles_post_ra>
